<compile_context>
chip_gen: v7x
topology: tpu7x:2x2x1
jax: 0.10.0
libtpu: 0.0.40
codegen_flags: <defaults>
</compile_context>

<pallas_src>
import jax
import jax.numpy as jnp
from jax import lax
from jax.experimental import pallas as pl
from jax.experimental.pallas import tpu as pltpu


def _lstm_recurrence_kernel(gxi_ref, gxf_ref, gxg_ref, gxo_ref, w_hh_ref, h_out_ref):
    """Serial LSTM recurrence only; all non-recurrent work is hoisted outside.

    gx{i,f,g,o}_ref : (T, B, H)  precomputed input contributions (incl. both biases)
    w_hh_ref        : (4, H, H)  per-gate recurrent weights, pre-transposed (h @ W)
    h_out_ref       : (T, B, H)  hidden state for every timestep
    """
    T, B, H = h_out_ref.shape

    # Per-gate recurrent weights, loaded once (hoisted out of the time loop).
    w_i = w_hh_ref[0]
    w_f = w_hh_ref[1]
    w_g = w_hh_ref[2]
    w_o = w_hh_ref[3]

    def step(t, carry):
        h, c = carry
        # Each gate: (B,H) @ (H,H) -> (B,H); no lane sub-slicing of a 4H vector.
        i_g = jax.nn.sigmoid(gxi_ref[t] + jnp.dot(h, w_i, preferred_element_type=jnp.float32))
        f_g = jax.nn.sigmoid(gxf_ref[t] + jnp.dot(h, w_f, preferred_element_type=jnp.float32))
        g_g = jnp.tanh(gxg_ref[t] + jnp.dot(h, w_g, preferred_element_type=jnp.float32))
        o_g = jax.nn.sigmoid(gxo_ref[t] + jnp.dot(h, w_o, preferred_element_type=jnp.float32))
        c_new = f_g * c + i_g * g_g
        h_new = o_g * jnp.tanh(c_new)
        h_out_ref[t] = h_new
        return h_new, c_new

    zeros = jnp.zeros((B, H), jnp.float32)   # h0 = c0 = 0 (PyTorch default)
    # Short, fixed trip count -> fully unroll so the LLO scheduler sees the
    # whole dependency chain and keeps h/c resident in vregs.
    lax.fori_loop(0, T, step, (zeros, zeros), unroll=True)


@jax.jit
def lstm_regressor_forward(pos, degree, params):
    """pos: (T, B, 3), degree: (T, B) -> (T, B, output_size)."""
    T, B, _ = pos.shape
    H = params["w_hh"].shape[1]

    # Glue: concatenate pos with unsqueezed degree -> (T, B, 4)
    x = jnp.concatenate([pos, degree[:, :, None]], axis=2).astype(jnp.float32)

    # Pad batch to a multiple of 8 so the (B, H) recurrent tiles fill full sublanes.
    B_pad = max(8, -(-B // 8) * 8)
    if B_pad != B:
        x = jnp.pad(x, ((0, 0), (0, B_pad - B), (0, 0)))

    # --- Hoisted non-recurrent input projection: one batched GEMM pair over T*B rows.
    x_flat = x.reshape(T * B_pad, 4)
    emb = x_flat @ params["w_emb"].T + params["b_emb"]                    # (T*B, E)
    gates_x = emb @ params["w_ih"].T + (params["b_ih"] + params["b_hh"])  # (T*B, 4H)
    gx = gates_x.reshape(T, B_pad, 4, H)                                  # explicit gate axis
    gx_i, gx_f, gx_g, gx_o = (gx[:, :, k, :] for k in range(4))           # each (T, B_pad, H)

    # Per-gate recurrent weights: w_hh is (4H, H) with row blocks [i; f; g; o].
    w_hh_g = params["w_hh"].reshape(4, H, H).transpose(0, 2, 1)           # (4, H, H); h @ w_hh_g[k]

    vmem = pl.BlockSpec(memory_space=pltpu.MemorySpace.VMEM)              # whole array, loaded once
    h_all = pl.pallas_call(
        _lstm_recurrence_kernel,
        out_shape=jax.ShapeDtypeStruct((T, B_pad, H), jnp.float32),
        in_specs=[vmem, vmem, vmem, vmem, vmem],
        out_specs=vmem,
        compiler_params=pltpu.CompilerParams(vmem_limit_bytes=64 << 20),
    )(gx_i, gx_f, gx_g, gx_o, w_hh_g)

    # --- Dropout(p=0.5) is eval-mode identity; hoisted output Linear as one GEMM.
    h_real = h_all[:, :B, :]                                              # (T, B, H)
    traj = h_real @ params["w_out"].T + params["b_out"]                   # (T, B, O)
    return traj


def _reference_forward(pos, degree, params):
    """Pure-JAX reference matching torch semantics (gate order i, f, g, o)."""
    H = params["w_hh"].shape[1]
    x = jnp.concatenate([pos, degree[:, :, None]], axis=2).astype(jnp.float32)
    emb = x @ params["w_emb"].T + params["b_emb"]          # (T, B, E)
    B = x.shape[1]

    def step(carry, e_t):
        h, c = carry
        gates = (e_t @ params["w_ih"].T + params["b_ih"]
                 + h @ params["w_hh"].T + params["b_hh"])
        i = jax.nn.sigmoid(gates[:, 0 * H:1 * H])
        f = jax.nn.sigmoid(gates[:, 1 * H:2 * H])
        g = jnp.tanh(gates[:, 2 * H:3 * H])
        o = jax.nn.sigmoid(gates[:, 3 * H:4 * H])
        c = f * c + i * g
        h = o * jnp.tanh(c)
        return (h, c), h

    h0 = jnp.zeros((B, H), jnp.float32)
    _, hs = lax.scan(step, (h0, h0), emb)
    return hs @ params["w_out"].T + params["b_out"]


def init_params(key, embedding_dim, hidden_dim, output_size):
    ks = jax.random.split(key, 8)
    s = 0.1
    return {
        "w_emb": s * jax.random.normal(ks[0], (embedding_dim, 4), jnp.float32),
        "b_emb": s * jax.random.normal(ks[1], (embedding_dim,), jnp.float32),
        "w_ih": s * jax.random.normal(ks[2], (4 * hidden_dim, embedding_dim), jnp.float32),
        "w_hh": s * jax.random.normal(ks[3], (4 * hidden_dim, hidden_dim), jnp.float32),
        "b_ih": s * jax.random.normal(ks[4], (4 * hidden_dim,), jnp.float32),
        "b_hh": s * jax.random.normal(ks[5], (4 * hidden_dim,), jnp.float32),
        "w_out": s * jax.random.normal(ks[6], (output_size, hidden_dim), jnp.float32),
        "b_out": s * jax.random.normal(ks[7], (output_size,), jnp.float32),
    }


if __name__ == "__main__":
    T, B = 8, 2
    embedding_dim, hidden_dim, output_size = 32, 32, 3

    key = jax.random.PRNGKey(0)
    k_pos, k_deg, k_par = jax.random.split(key, 3)

    pos = jax.random.normal(k_pos, (T, B, 3), jnp.float32)
    degree = jax.random.normal(k_deg, (T, B), jnp.float32)
    params = init_params(k_par, embedding_dim, hidden_dim, output_size)

    traj = lstm_regressor_forward(pos, degree, params)
    jax.block_until_ready(traj)

    assert traj.shape == (T, B, output_size), traj.shape
    assert bool(jnp.all(jnp.isfinite(traj)))

    ref = _reference_forward(pos, degree, params)
    max_err = float(jnp.max(jnp.abs(traj - ref)))
    assert jnp.allclose(traj, ref, atol=5e-3, rtol=5e-2), f"max abs err = {max_err}"

    print("KERNEL_OK")
</pallas_src>

<mosaic_0001>
module attributes {stable_mosaic.version = 11 : i64} {
  func.func @_lstm_recurrence_kernel(%arg0: memref<8x8x32xf32, #tpu.memory_space<vmem>>, %arg1: memref<8x8x32xf32, #tpu.memory_space<vmem>>, %arg2: memref<8x8x32xf32, #tpu.memory_space<vmem>>, %arg3: memref<8x8x32xf32, #tpu.memory_space<vmem>>, %arg4: memref<4x32x32xf32, #tpu.memory_space<vmem>>, %arg5: memref<8x8x32xf32, #tpu.memory_space<vmem>>) attributes {dimension_semantics = [], scalar_prefetch = 0 : i64, scratch_operands = 0 : i64, tpu.core_type = #tpu.core_type<tc>} {
    %c0 = arith.constant 0 : index
    %c0_0 = arith.constant 0 : index
    %c0_1 = arith.constant 0 : index
    %0 = vector.load %arg4[%c0, %c0_0, %c0_1] : memref<4x32x32xf32, #tpu.memory_space<vmem>>, vector<1x32x32xf32>
    %1 = vector.shape_cast %0 : vector<1x32x32xf32> to vector<32x32xf32>
    %c1 = arith.constant 1 : index
    %c0_2 = arith.constant 0 : index
    %c0_3 = arith.constant 0 : index
    %2 = vector.load %arg4[%c1, %c0_2, %c0_3] : memref<4x32x32xf32, #tpu.memory_space<vmem>>, vector<1x32x32xf32>
    %3 = vector.shape_cast %2 : vector<1x32x32xf32> to vector<32x32xf32>
    %c2 = arith.constant 2 : index
    %c0_4 = arith.constant 0 : index
    %c0_5 = arith.constant 0 : index
    %4 = vector.load %arg4[%c2, %c0_4, %c0_5] : memref<4x32x32xf32, #tpu.memory_space<vmem>>, vector<1x32x32xf32>
    %5 = vector.shape_cast %4 : vector<1x32x32xf32> to vector<32x32xf32>
    %c3 = arith.constant 3 : index
    %c0_6 = arith.constant 0 : index
    %c0_7 = arith.constant 0 : index
    %6 = vector.load %arg4[%c3, %c0_6, %c0_7] : memref<4x32x32xf32, #tpu.memory_space<vmem>>, vector<1x32x32xf32>
    %7 = vector.shape_cast %6 : vector<1x32x32xf32> to vector<32x32xf32>
    %cst = arith.constant 0.000000e+00 : f32
    %8 = vector.broadcast %cst : f32 to vector<8x32xf32>
    %c0_i32 = arith.constant 0 : i32
    %9 = arith.index_cast %c0_i32 : i32 to index
    %c0_8 = arith.constant 0 : index
    %c0_9 = arith.constant 0 : index
    %10 = vector.load %arg0[%9, %c0_8, %c0_9] : memref<8x8x32xf32, #tpu.memory_space<vmem>>, vector<1x8x32xf32>
    %11 = vector.shape_cast %10 : vector<1x8x32xf32> to vector<8x32xf32>
    %cst_10 = arith.constant dense<0.000000e+00> : vector<8x32xf32>
    %12 = tpu.matmul %8, %1, %cst_10 {dimension_numbers = #tpu.dot_dimension_numbers<[1], [0], [0], [1], [0, 0, 1, 1], [], []>} : vector<8x32xf32>, vector<32x32xf32>, vector<8x32xf32> -> vector<8x32xf32>
    %13 = arith.addf %11, %12 : vector<8x32xf32>
    %14 = arith.negf %13 : vector<8x32xf32>
    %15 = math.exp %14 : vector<8x32xf32>
    %cst_11 = arith.constant 1.000000e+00 : f32
    %16 = vector.broadcast %cst_11 : f32 to vector<8x32xf32>
    %17 = arith.addf %16, %15 : vector<8x32xf32>
    %18 = arith.divf %16, %17 : vector<8x32xf32>
    %19 = arith.index_cast %c0_i32 : i32 to index
    %c0_12 = arith.constant 0 : index
    %c0_13 = arith.constant 0 : index
    %20 = vector.load %arg1[%19, %c0_12, %c0_13] : memref<8x8x32xf32, #tpu.memory_space<vmem>>, vector<1x8x32xf32>
    %21 = vector.shape_cast %20 : vector<1x8x32xf32> to vector<8x32xf32>
    %cst_14 = arith.constant dense<0.000000e+00> : vector<8x32xf32>
    %22 = tpu.matmul %8, %3, %cst_14 {dimension_numbers = #tpu.dot_dimension_numbers<[1], [0], [0], [1], [0, 0, 1, 1], [], []>} : vector<8x32xf32>, vector<32x32xf32>, vector<8x32xf32> -> vector<8x32xf32>
    %23 = arith.addf %21, %22 : vector<8x32xf32>
    %24 = arith.negf %23 : vector<8x32xf32>
    %25 = math.exp %24 : vector<8x32xf32>
    %cst_15 = arith.constant 1.000000e+00 : f32
    %26 = vector.broadcast %cst_15 : f32 to vector<8x32xf32>
    %27 = arith.addf %26, %25 : vector<8x32xf32>
    %28 = arith.divf %26, %27 : vector<8x32xf32>
    %29 = arith.index_cast %c0_i32 : i32 to index
    %c0_16 = arith.constant 0 : index
    %c0_17 = arith.constant 0 : index
    %30 = vector.load %arg2[%29, %c0_16, %c0_17] : memref<8x8x32xf32, #tpu.memory_space<vmem>>, vector<1x8x32xf32>
    %31 = vector.shape_cast %30 : vector<1x8x32xf32> to vector<8x32xf32>
    %cst_18 = arith.constant dense<0.000000e+00> : vector<8x32xf32>
    %32 = tpu.matmul %8, %5, %cst_18 {dimension_numbers = #tpu.dot_dimension_numbers<[1], [0], [0], [1], [0, 0, 1, 1], [], []>} : vector<8x32xf32>, vector<32x32xf32>, vector<8x32xf32> -> vector<8x32xf32>
    %33 = arith.addf %31, %32 : vector<8x32xf32>
    %34 = math.tanh %33 : vector<8x32xf32>
    %35 = arith.index_cast %c0_i32 : i32 to index
    %c0_19 = arith.constant 0 : index
    %c0_20 = arith.constant 0 : index
    %36 = vector.load %arg3[%35, %c0_19, %c0_20] : memref<8x8x32xf32, #tpu.memory_space<vmem>>, vector<1x8x32xf32>
    %37 = vector.shape_cast %36 : vector<1x8x32xf32> to vector<8x32xf32>
    %cst_21 = arith.constant dense<0.000000e+00> : vector<8x32xf32>
    %38 = tpu.matmul %8, %7, %cst_21 {dimension_numbers = #tpu.dot_dimension_numbers<[1], [0], [0], [1], [0, 0, 1, 1], [], []>} : vector<8x32xf32>, vector<32x32xf32>, vector<8x32xf32> -> vector<8x32xf32>
    %39 = arith.addf %37, %38 : vector<8x32xf32>
    %40 = arith.negf %39 : vector<8x32xf32>
    %41 = math.exp %40 : vector<8x32xf32>
    %cst_22 = arith.constant 1.000000e+00 : f32
    %42 = vector.broadcast %cst_22 : f32 to vector<8x32xf32>
    %43 = arith.addf %42, %41 : vector<8x32xf32>
    %44 = arith.divf %42, %43 : vector<8x32xf32>
    %45 = arith.mulf %28, %8 : vector<8x32xf32>
    %46 = arith.mulf %18, %34 : vector<8x32xf32>
    %47 = arith.addf %45, %46 : vector<8x32xf32>
    %48 = math.tanh %47 : vector<8x32xf32>
    %49 = arith.mulf %44, %48 : vector<8x32xf32>
    %50 = arith.index_cast %c0_i32 : i32 to index
    %c0_23 = arith.constant 0 : index
    %c0_24 = arith.constant 0 : index
    %51 = vector.load %arg5[%50, %c0_23, %c0_24] : memref<8x8x32xf32, #tpu.memory_space<vmem>>, vector<1x8x32xf32>
    %52 = vector.shape_cast %51 : vector<1x8x32xf32> to vector<8x32xf32>
    %53 = vector.shape_cast %49 : vector<8x32xf32> to vector<1x8x32xf32>
    tpu.vector_store %arg5[%50, %c0_23, %c0_24], %53 {strides = array<i32>} : memref<8x8x32xf32, #tpu.memory_space<vmem>>, vector<1x8x32xf32>,
    %c1_i32 = arith.constant 1 : i32
    %54 = arith.index_cast %c1_i32 : i32 to index
    %c0_25 = arith.constant 0 : index
    %c0_26 = arith.constant 0 : index
    %55 = vector.load %arg0[%54, %c0_25, %c0_26] : memref<8x8x32xf32, #tpu.memory_space<vmem>>, vector<1x8x32xf32>
    %56 = vector.shape_cast %55 : vector<1x8x32xf32> to vector<8x32xf32>
    %cst_27 = arith.constant dense<0.000000e+00> : vector<8x32xf32>
    %57 = tpu.matmul %49, %1, %cst_27 {dimension_numbers = #tpu.dot_dimension_numbers<[1], [0], [0], [1], [0, 0, 1, 1], [], []>} : vector<8x32xf32>, vector<32x32xf32>, vector<8x32xf32> -> vector<8x32xf32>
    %58 = arith.addf %56, %57 : vector<8x32xf32>
    %59 = arith.negf %58 : vector<8x32xf32>
    %60 = math.exp %59 : vector<8x32xf32>
    %cst_28 = arith.constant 1.000000e+00 : f32
    %61 = vector.broadcast %cst_28 : f32 to vector<8x32xf32>
    %62 = arith.addf %61, %60 : vector<8x32xf32>
    %63 = arith.divf %61, %62 : vector<8x32xf32>
    %64 = arith.index_cast %c1_i32 : i32 to index
    %c0_29 = arith.constant 0 : index
    %c0_30 = arith.constant 0 : index
    %65 = vector.load %arg1[%64, %c0_29, %c0_30] : memref<8x8x32xf32, #tpu.memory_space<vmem>>, vector<1x8x32xf32>
    %66 = vector.shape_cast %65 : vector<1x8x32xf32> to vector<8x32xf32>
    %cst_31 = arith.constant dense<0.000000e+00> : vector<8x32xf32>
    %67 = tpu.matmul %49, %3, %cst_31 {dimension_numbers = #tpu.dot_dimension_numbers<[1], [0], [0], [1], [0, 0, 1, 1], [], []>} : vector<8x32xf32>, vector<32x32xf32>, vector<8x32xf32> -> vector<8x32xf32>
    %68 = arith.addf %66, %67 : vector<8x32xf32>
    %69 = arith.negf %68 : vector<8x32xf32>
    %70 = math.exp %69 : vector<8x32xf32>
    %cst_32 = arith.constant 1.000000e+00 : f32
    %71 = vector.broadcast %cst_32 : f32 to vector<8x32xf32>
    %72 = arith.addf %71, %70 : vector<8x32xf32>
    %73 = arith.divf %71, %72 : vector<8x32xf32>
    %74 = arith.index_cast %c1_i32 : i32 to index
    %c0_33 = arith.constant 0 : index
    %c0_34 = arith.constant 0 : index
    %75 = vector.load %arg2[%74, %c0_33, %c0_34] : memref<8x8x32xf32, #tpu.memory_space<vmem>>, vector<1x8x32xf32>
    %76 = vector.shape_cast %75 : vector<1x8x32xf32> to vector<8x32xf32>
    %cst_35 = arith.constant dense<0.000000e+00> : vector<8x32xf32>
    %77 = tpu.matmul %49, %5, %cst_35 {dimension_numbers = #tpu.dot_dimension_numbers<[1], [0], [0], [1], [0, 0, 1, 1], [], []>} : vector<8x32xf32>, vector<32x32xf32>, vector<8x32xf32> -> vector<8x32xf32>
    %78 = arith.addf %76, %77 : vector<8x32xf32>
    %79 = math.tanh %78 : vector<8x32xf32>
    %80 = arith.index_cast %c1_i32 : i32 to index
    %c0_36 = arith.constant 0 : index
    %c0_37 = arith.constant 0 : index
    %81 = vector.load %arg3[%80, %c0_36, %c0_37] : memref<8x8x32xf32, #tpu.memory_space<vmem>>, vector<1x8x32xf32>
    %82 = vector.shape_cast %81 : vector<1x8x32xf32> to vector<8x32xf32>
    %cst_38 = arith.constant dense<0.000000e+00> : vector<8x32xf32>
    %83 = tpu.matmul %49, %7, %cst_38 {dimension_numbers = #tpu.dot_dimension_numbers<[1], [0], [0], [1], [0, 0, 1, 1], [], []>} : vector<8x32xf32>, vector<32x32xf32>, vector<8x32xf32> -> vector<8x32xf32>
    %84 = arith.addf %82, %83 : vector<8x32xf32>
    %85 = arith.negf %84 : vector<8x32xf32>
    %86 = math.exp %85 : vector<8x32xf32>
    %cst_39 = arith.constant 1.000000e+00 : f32
    %87 = vector.broadcast %cst_39 : f32 to vector<8x32xf32>
    %88 = arith.addf %87, %86 : vector<8x32xf32>
    %89 = arith.divf %87, %88 : vector<8x32xf32>
    %90 = arith.mulf %73, %47 : vector<8x32xf32>
    %91 = arith.mulf %63, %79 : vector<8x32xf32>
    %92 = arith.addf %90, %91 : vector<8x32xf32>
    %93 = math.tanh %92 : vector<8x32xf32>
    %94 = arith.mulf %89, %93 : vector<8x32xf32>
    %95 = arith.index_cast %c1_i32 : i32 to index
    %c0_40 = arith.constant 0 : index
    %c0_41 = arith.constant 0 : index
    %96 = vector.load %arg5[%95, %c0_40, %c0_41] : memref<8x8x32xf32, #tpu.memory_space<vmem>>, vector<1x8x32xf32>
    %97 = vector.shape_cast %96 : vector<1x8x32xf32> to vector<8x32xf32>
    %98 = vector.shape_cast %94 : vector<8x32xf32> to vector<1x8x32xf32>
    tpu.vector_store %arg5[%95, %c0_40, %c0_41], %98 {strides = array<i32>} : memref<8x8x32xf32, #tpu.memory_space<vmem>>, vector<1x8x32xf32>,
    %c2_i32 = arith.constant 2 : i32
    %99 = arith.index_cast %c2_i32 : i32 to index
    %c0_42 = arith.constant 0 : index
    %c0_43 = arith.constant 0 : index
    %100 = vector.load %arg0[%99, %c0_42, %c0_43] : memref<8x8x32xf32, #tpu.memory_space<vmem>>, vector<1x8x32xf32>
    %101 = vector.shape_cast %100 : vector<1x8x32xf32> to vector<8x32xf32>
    %cst_44 = arith.constant dense<0.000000e+00> : vector<8x32xf32>
    %102 = tpu.matmul %94, %1, %cst_44 {dimension_numbers = #tpu.dot_dimension_numbers<[1], [0], [0], [1], [0, 0, 1, 1], [], []>} : vector<8x32xf32>, vector<32x32xf32>, vector<8x32xf32> -> vector<8x32xf32>
    %103 = arith.addf %101, %102 : vector<8x32xf32>
    %104 = arith.negf %103 : vector<8x32xf32>
    %105 = math.exp %104 : vector<8x32xf32>
    %cst_45 = arith.constant 1.000000e+00 : f32
    %106 = vector.broadcast %cst_45 : f32 to vector<8x32xf32>
    %107 = arith.addf %106, %105 : vector<8x32xf32>
    %108 = arith.divf %106, %107 : vector<8x32xf32>
    %109 = arith.index_cast %c2_i32 : i32 to index
    %c0_46 = arith.constant 0 : index
    %c0_47 = arith.constant 0 : index
    %110 = vector.load %arg1[%109, %c0_46, %c0_47] : memref<8x8x32xf32, #tpu.memory_space<vmem>>, vector<1x8x32xf32>
    %111 = vector.shape_cast %110 : vector<1x8x32xf32> to vector<8x32xf32>
    %cst_48 = arith.constant dense<0.000000e+00> : vector<8x32xf32>
    %112 = tpu.matmul %94, %3, %cst_48 {dimension_numbers = #tpu.dot_dimension_numbers<[1], [0], [0], [1], [0, 0, 1, 1], [], []>} : vector<8x32xf32>, vector<32x32xf32>, vector<8x32xf32> -> vector<8x32xf32>
    %113 = arith.addf %111, %112 : vector<8x32xf32>
    %114 = arith.negf %113 : vector<8x32xf32>
    %115 = math.exp %114 : vector<8x32xf32>
    %cst_49 = arith.constant 1.000000e+00 : f32
    %116 = vector.broadcast %cst_49 : f32 to vector<8x32xf32>
    %117 = arith.addf %116, %115 : vector<8x32xf32>
    %118 = arith.divf %116, %117 : vector<8x32xf32>
    %119 = arith.index_cast %c2_i32 : i32 to index
    %c0_50 = arith.constant 0 : index
    %c0_51 = arith.constant 0 : index
    %120 = vector.load %arg2[%119, %c0_50, %c0_51] : memref<8x8x32xf32, #tpu.memory_space<vmem>>, vector<1x8x32xf32>
    %121 = vector.shape_cast %120 : vector<1x8x32xf32> to vector<8x32xf32>
    %cst_52 = arith.constant dense<0.000000e+00> : vector<8x32xf32>
    %122 = tpu.matmul %94, %5, %cst_52 {dimension_numbers = #tpu.dot_dimension_numbers<[1], [0], [0], [1], [0, 0, 1, 1], [], []>} : vector<8x32xf32>, vector<32x32xf32>, vector<8x32xf32> -> vector<8x32xf32>
    %123 = arith.addf %121, %122 : vector<8x32xf32>
    %124 = math.tanh %123 : vector<8x32xf32>
    %125 = arith.index_cast %c2_i32 : i32 to index
    %c0_53 = arith.constant 0 : index
    %c0_54 = arith.constant 0 : index
    %126 = vector.load %arg3[%125, %c0_53, %c0_54] : memref<8x8x32xf32, #tpu.memory_space<vmem>>, vector<1x8x32xf32>
    %127 = vector.shape_cast %126 : vector<1x8x32xf32> to vector<8x32xf32>
    %cst_55 = arith.constant dense<0.000000e+00> : vector<8x32xf32>
    %128 = tpu.matmul %94, %7, %cst_55 {dimension_numbers = #tpu.dot_dimension_numbers<[1], [0], [0], [1], [0, 0, 1, 1], [], []>} : vector<8x32xf32>, vector<32x32xf32>, vector<8x32xf32> -> vector<8x32xf32>
    %129 = arith.addf %127, %128 : vector<8x32xf32>
    %130 = arith.negf %129 : vector<8x32xf32>
    %131 = math.exp %130 : vector<8x32xf32>
    %cst_56 = arith.constant 1.000000e+00 : f32
    %132 = vector.broadcast %cst_56 : f32 to vector<8x32xf32>
    %133 = arith.addf %132, %131 : vector<8x32xf32>
    %134 = arith.divf %132, %133 : vector<8x32xf32>
    %135 = arith.mulf %118, %92 : vector<8x32xf32>
    %136 = arith.mulf %108, %124 : vector<8x32xf32>
    %137 = arith.addf %135, %136 : vector<8x32xf32>
    %138 = math.tanh %137 : vector<8x32xf32>
    %139 = arith.mulf %134, %138 : vector<8x32xf32>
    %140 = arith.index_cast %c2_i32 : i32 to index
    %c0_57 = arith.constant 0 : index
    %c0_58 = arith.constant 0 : index
    %141 = vector.load %arg5[%140, %c0_57, %c0_58] : memref<8x8x32xf32, #tpu.memory_space<vmem>>, vector<1x8x32xf32>
    %142 = vector.shape_cast %141 : vector<1x8x32xf32> to vector<8x32xf32>
    %143 = vector.shape_cast %139 : vector<8x32xf32> to vector<1x8x32xf32>
    tpu.vector_store %arg5[%140, %c0_57, %c0_58], %143 {strides = array<i32>} : memref<8x8x32xf32, #tpu.memory_space<vmem>>, vector<1x8x32xf32>,
    %c3_i32 = arith.constant 3 : i32
    %144 = arith.index_cast %c3_i32 : i32 to index
    %c0_59 = arith.constant 0 : index
    %c0_60 = arith.constant 0 : index
    %145 = vector.load %arg0[%144, %c0_59, %c0_60] : memref<8x8x32xf32, #tpu.memory_space<vmem>>, vector<1x8x32xf32>
    %146 = vector.shape_cast %145 : vector<1x8x32xf32> to vector<8x32xf32>
    %cst_61 = arith.constant dense<0.000000e+00> : vector<8x32xf32>
    %147 = tpu.matmul %139, %1, %cst_61 {dimension_numbers = #tpu.dot_dimension_numbers<[1], [0], [0], [1], [0, 0, 1, 1], [], []>} : vector<8x32xf32>, vector<32x32xf32>, vector<8x32xf32> -> vector<8x32xf32>
    %148 = arith.addf %146, %147 : vector<8x32xf32>
    %149 = arith.negf %148 : vector<8x32xf32>
    %150 = math.exp %149 : vector<8x32xf32>
    %cst_62 = arith.constant 1.000000e+00 : f32
    %151 = vector.broadcast %cst_62 : f32 to vector<8x32xf32>
    %152 = arith.addf %151, %150 : vector<8x32xf32>
    %153 = arith.divf %151, %152 : vector<8x32xf32>
    %154 = arith.index_cast %c3_i32 : i32 to index
    %c0_63 = arith.constant 0 : index
    %c0_64 = arith.constant 0 : index
    %155 = vector.load %arg1[%154, %c0_63, %c0_64] : memref<8x8x32xf32, #tpu.memory_space<vmem>>, vector<1x8x32xf32>
    %156 = vector.shape_cast %155 : vector<1x8x32xf32> to vector<8x32xf32>
    %cst_65 = arith.constant dense<0.000000e+00> : vector<8x32xf32>
    %157 = tpu.matmul %139, %3, %cst_65 {dimension_numbers = #tpu.dot_dimension_numbers<[1], [0], [0], [1], [0, 0, 1, 1], [], []>} : vector<8x32xf32>, vector<32x32xf32>, vector<8x32xf32> -> vector<8x32xf32>
    %158 = arith.addf %156, %157 : vector<8x32xf32>
    %159 = arith.negf %158 : vector<8x32xf32>
    %160 = math.exp %159 : vector<8x32xf32>
    %cst_66 = arith.constant 1.000000e+00 : f32
    %161 = vector.broadcast %cst_66 : f32 to vector<8x32xf32>
    %162 = arith.addf %161, %160 : vector<8x32xf32>
    %163 = arith.divf %161, %162 : vector<8x32xf32>
    %164 = arith.index_cast %c3_i32 : i32 to index
    %c0_67 = arith.constant 0 : index
    %c0_68 = arith.constant 0 : index
    %165 = vector.load %arg2[%164, %c0_67, %c0_68] : memref<8x8x32xf32, #tpu.memory_space<vmem>>, vector<1x8x32xf32>
    %166 = vector.shape_cast %165 : vector<1x8x32xf32> to vector<8x32xf32>
    %cst_69 = arith.constant dense<0.000000e+00> : vector<8x32xf32>
    %167 = tpu.matmul %139, %5, %cst_69 {dimension_numbers = #tpu.dot_dimension_numbers<[1], [0], [0], [1], [0, 0, 1, 1], [], []>} : vector<8x32xf32>, vector<32x32xf32>, vector<8x32xf32> -> vector<8x32xf32>
    %168 = arith.addf %166, %167 : vector<8x32xf32>
    %169 = math.tanh %168 : vector<8x32xf32>
    %170 = arith.index_cast %c3_i32 : i32 to index
    %c0_70 = arith.constant 0 : index
    %c0_71 = arith.constant 0 : index
    %171 = vector.load %arg3[%170, %c0_70, %c0_71] : memref<8x8x32xf32, #tpu.memory_space<vmem>>, vector<1x8x32xf32>
    %172 = vector.shape_cast %171 : vector<1x8x32xf32> to vector<8x32xf32>
    %cst_72 = arith.constant dense<0.000000e+00> : vector<8x32xf32>
    %173 = tpu.matmul %139, %7, %cst_72 {dimension_numbers = #tpu.dot_dimension_numbers<[1], [0], [0], [1], [0, 0, 1, 1], [], []>} : vector<8x32xf32>, vector<32x32xf32>, vector<8x32xf32> -> vector<8x32xf32>
    %174 = arith.addf %172, %173 : vector<8x32xf32>
    %175 = arith.negf %174 : vector<8x32xf32>
    %176 = math.exp %175 : vector<8x32xf32>
    %cst_73 = arith.constant 1.000000e+00 : f32
    %177 = vector.broadcast %cst_73 : f32 to vector<8x32xf32>
    %178 = arith.addf %177, %176 : vector<8x32xf32>
    %179 = arith.divf %177, %178 : vector<8x32xf32>
    %180 = arith.mulf %163, %137 : vector<8x32xf32>
    %181 = arith.mulf %153, %169 : vector<8x32xf32>
    %182 = arith.addf %180, %181 : vector<8x32xf32>
    %183 = math.tanh %182 : vector<8x32xf32>
    %184 = arith.mulf %179, %183 : vector<8x32xf32>
    %185 = arith.index_cast %c3_i32 : i32 to index
    %c0_74 = arith.constant 0 : index
    %c0_75 = arith.constant 0 : index
    %186 = vector.load %arg5[%185, %c0_74, %c0_75] : memref<8x8x32xf32, #tpu.memory_space<vmem>>, vector<1x8x32xf32>
    %187 = vector.shape_cast %186 : vector<1x8x32xf32> to vector<8x32xf32>
    %188 = vector.shape_cast %184 : vector<8x32xf32> to vector<1x8x32xf32>
    tpu.vector_store %arg5[%185, %c0_74, %c0_75], %188 {strides = array<i32>} : memref<8x8x32xf32, #tpu.memory_space<vmem>>, vector<1x8x32xf32>,
    %c4_i32 = arith.constant 4 : i32
    %189 = arith.index_cast %c4_i32 : i32 to index
    %c0_76 = arith.constant 0 : index
    %c0_77 = arith.constant 0 : index
    %190 = vector.load %arg0[%189, %c0_76, %c0_77] : memref<8x8x32xf32, #tpu.memory_space<vmem>>, vector<1x8x32xf32>
    %191 = vector.shape_cast %190 : vector<1x8x32xf32> to vector<8x32xf32>
    %cst_78 = arith.constant dense<0.000000e+00> : vector<8x32xf32>
    %192 = tpu.matmul %184, %1, %cst_78 {dimension_numbers = #tpu.dot_dimension_numbers<[1], [0], [0], [1], [0, 0, 1, 1], [], []>} : vector<8x32xf32>, vector<32x32xf32>, vector<8x32xf32> -> vector<8x32xf32>
    %193 = arith.addf %191, %192 : vector<8x32xf32>
    %194 = arith.negf %193 : vector<8x32xf32>
    %195 = math.exp %194 : vector<8x32xf32>
    %cst_79 = arith.constant 1.000000e+00 : f32
    %196 = vector.broadcast %cst_79 : f32 to vector<8x32xf32>
    %197 = arith.addf %196, %195 : vector<8x32xf32>
    %198 = arith.divf %196, %197 : vector<8x32xf32>
    %199 = arith.index_cast %c4_i32 : i32 to index
    %c0_80 = arith.constant 0 : index
    %c0_81 = arith.constant 0 : index
    %200 = vector.load %arg1[%199, %c0_80, %c0_81] : memref<8x8x32xf32, #tpu.memory_space<vmem>>, vector<1x8x32xf32>
    %201 = vector.shape_cast %200 : vector<1x8x32xf32> to vector<8x32xf32>
    %cst_82 = arith.constant dense<0.000000e+00> : vector<8x32xf32>
    %202 = tpu.matmul %184, %3, %cst_82 {dimension_numbers = #tpu.dot_dimension_numbers<[1], [0], [0], [1], [0, 0, 1, 1], [], []>} : vector<8x32xf32>, vector<32x32xf32>, vector<8x32xf32> -> vector<8x32xf32>
    %203 = arith.addf %201, %202 : vector<8x32xf32>
    %204 = arith.negf %203 : vector<8x32xf32>
    %205 = math.exp %204 : vector<8x32xf32>
    %cst_83 = arith.constant 1.000000e+00 : f32
    %206 = vector.broadcast %cst_83 : f32 to vector<8x32xf32>
    %207 = arith.addf %206, %205 : vector<8x32xf32>
    %208 = arith.divf %206, %207 : vector<8x32xf32>
    %209 = arith.index_cast %c4_i32 : i32 to index
    %c0_84 = arith.constant 0 : index
    %c0_85 = arith.constant 0 : index
    %210 = vector.load %arg2[%209, %c0_84, %c0_85] : memref<8x8x32xf32, #tpu.memory_space<vmem>>, vector<1x8x32xf32>
    %211 = vector.shape_cast %210 : vector<1x8x32xf32> to vector<8x32xf32>
    %cst_86 = arith.constant dense<0.000000e+00> : vector<8x32xf32>
    %212 = tpu.matmul %184, %5, %cst_86 {dimension_numbers = #tpu.dot_dimension_numbers<[1], [0], [0], [1], [0, 0, 1, 1], [], []>} : vector<8x32xf32>, vector<32x32xf32>, vector<8x32xf32> -> vector<8x32xf32>
    %213 = arith.addf %211, %212 : vector<8x32xf32>
    %214 = math.tanh %213 : vector<8x32xf32>
    %215 = arith.index_cast %c4_i32 : i32 to index
    %c0_87 = arith.constant 0 : index
    %c0_88 = arith.constant 0 : index
    %216 = vector.load %arg3[%215, %c0_87, %c0_88] : memref<8x8x32xf32, #tpu.memory_space<vmem>>, vector<1x8x32xf32>
    %217 = vector.shape_cast %216 : vector<1x8x32xf32> to vector<8x32xf32>
    %cst_89 = arith.constant dense<0.000000e+00> : vector<8x32xf32>
    %218 = tpu.matmul %184, %7, %cst_89 {dimension_numbers = #tpu.dot_dimension_numbers<[1], [0], [0], [1], [0, 0, 1, 1], [], []>} : vector<8x32xf32>, vector<32x32xf32>, vector<8x32xf32> -> vector<8x32xf32>
    %219 = arith.addf %217, %218 : vector<8x32xf32>
    %220 = arith.negf %219 : vector<8x32xf32>
    %221 = math.exp %220 : vector<8x32xf32>
    %cst_90 = arith.constant 1.000000e+00 : f32
    %222 = vector.broadcast %cst_90 : f32 to vector<8x32xf32>
    %223 = arith.addf %222, %221 : vector<8x32xf32>
    %224 = arith.divf %222, %223 : vector<8x32xf32>
    %225 = arith.mulf %208, %182 : vector<8x32xf32>
    %226 = arith.mulf %198, %214 : vector<8x32xf32>
    %227 = arith.addf %225, %226 : vector<8x32xf32>
    %228 = math.tanh %227 : vector<8x32xf32>
    %229 = arith.mulf %224, %228 : vector<8x32xf32>
    %230 = arith.index_cast %c4_i32 : i32 to index
    %c0_91 = arith.constant 0 : index
    %c0_92 = arith.constant 0 : index
    %231 = vector.load %arg5[%230, %c0_91, %c0_92] : memref<8x8x32xf32, #tpu.memory_space<vmem>>, vector<1x8x32xf32>
    %232 = vector.shape_cast %231 : vector<1x8x32xf32> to vector<8x32xf32>
    %233 = vector.shape_cast %229 : vector<8x32xf32> to vector<1x8x32xf32>
    tpu.vector_store %arg5[%230, %c0_91, %c0_92], %233 {strides = array<i32>} : memref<8x8x32xf32, #tpu.memory_space<vmem>>, vector<1x8x32xf32>,
    %c5_i32 = arith.constant 5 : i32
    %234 = arith.index_cast %c5_i32 : i32 to index
    %c0_93 = arith.constant 0 : index
    %c0_94 = arith.constant 0 : index
    %235 = vector.load %arg0[%234, %c0_93, %c0_94] : memref<8x8x32xf32, #tpu.memory_space<vmem>>, vector<1x8x32xf32>
    %236 = vector.shape_cast %235 : vector<1x8x32xf32> to vector<8x32xf32>
    %cst_95 = arith.constant dense<0.000000e+00> : vector<8x32xf32>
    %237 = tpu.matmul %229, %1, %cst_95 {dimension_numbers = #tpu.dot_dimension_numbers<[1], [0], [0], [1], [0, 0, 1, 1], [], []>} : vector<8x32xf32>, vector<32x32xf32>, vector<8x32xf32> -> vector<8x32xf32>
    %238 = arith.addf %236, %237 : vector<8x32xf32>
    %239 = arith.negf %238 : vector<8x32xf32>
    %240 = math.exp %239 : vector<8x32xf32>
    %cst_96 = arith.constant 1.000000e+00 : f32
    %241 = vector.broadcast %cst_96 : f32 to vector<8x32xf32>
    %242 = arith.addf %241, %240 : vector<8x32xf32>
    %243 = arith.divf %241, %242 : vector<8x32xf32>
    %244 = arith.index_cast %c5_i32 : i32 to index
    %c0_97 = arith.constant 0 : index
    %c0_98 = arith.constant 0 : index
    %245 = vector.load %arg1[%244, %c0_97, %c0_98] : memref<8x8x32xf32, #tpu.memory_space<vmem>>, vector<1x8x32xf32>
    %246 = vector.shape_cast %245 : vector<1x8x32xf32> to vector<8x32xf32>
    %cst_99 = arith.constant dense<0.000000e+00> : vector<8x32xf32>
    %247 = tpu.matmul %229, %3, %cst_99 {dimension_numbers = #tpu.dot_dimension_numbers<[1], [0], [0], [1], [0, 0, 1, 1], [], []>} : vector<8x32xf32>, vector<32x32xf32>, vector<8x32xf32> -> vector<8x32xf32>
    %248 = arith.addf %246, %247 : vector<8x32xf32>
    %249 = arith.negf %248 : vector<8x32xf32>
    %250 = math.exp %249 : vector<8x32xf32>
    %cst_100 = arith.constant 1.000000e+00 : f32
    %251 = vector.broadcast %cst_100 : f32 to vector<8x32xf32>
    %252 = arith.addf %251, %250 : vector<8x32xf32>
    %253 = arith.divf %251, %252 : vector<8x32xf32>
    %254 = arith.index_cast %c5_i32 : i32 to index
    %c0_101 = arith.constant 0 : index
    %c0_102 = arith.constant 0 : index
    %255 = vector.load %arg2[%254, %c0_101, %c0_102] : memref<8x8x32xf32, #tpu.memory_space<vmem>>, vector<1x8x32xf32>
    %256 = vector.shape_cast %255 : vector<1x8x32xf32> to vector<8x32xf32>
    %cst_103 = arith.constant dense<0.000000e+00> : vector<8x32xf32>
    %257 = tpu.matmul %229, %5, %cst_103 {dimension_numbers = #tpu.dot_dimension_numbers<[1], [0], [0], [1], [0, 0, 1, 1], [], []>} : vector<8x32xf32>, vector<32x32xf32>, vector<8x32xf32> -> vector<8x32xf32>
    %258 = arith.addf %256, %257 : vector<8x32xf32>
    %259 = math.tanh %258 : vector<8x32xf32>
    %260 = arith.index_cast %c5_i32 : i32 to index
    %c0_104 = arith.constant 0 : index
    %c0_105 = arith.constant 0 : index
    %261 = vector.load %arg3[%260, %c0_104, %c0_105] : memref<8x8x32xf32, #tpu.memory_space<vmem>>, vector<1x8x32xf32>
    %262 = vector.shape_cast %261 : vector<1x8x32xf32> to vector<8x32xf32>
    %cst_106 = arith.constant dense<0.000000e+00> : vector<8x32xf32>
    %263 = tpu.matmul %229, %7, %cst_106 {dimension_numbers = #tpu.dot_dimension_numbers<[1], [0], [0], [1], [0, 0, 1, 1], [], []>} : vector<8x32xf32>, vector<32x32xf32>, vector<8x32xf32> -> vector<8x32xf32>
    %264 = arith.addf %262, %263 : vector<8x32xf32>
    %265 = arith.negf %264 : vector<8x32xf32>
    %266 = math.exp %265 : vector<8x32xf32>
    %cst_107 = arith.constant 1.000000e+00 : f32
    %267 = vector.broadcast %cst_107 : f32 to vector<8x32xf32>
    %268 = arith.addf %267, %266 : vector<8x32xf32>
    %269 = arith.divf %267, %268 : vector<8x32xf32>
    %270 = arith.mulf %253, %227 : vector<8x32xf32>
    %271 = arith.mulf %243, %259 : vector<8x32xf32>
    %272 = arith.addf %270, %271 : vector<8x32xf32>
    %273 = math.tanh %272 : vector<8x32xf32>
    %274 = arith.mulf %269, %273 : vector<8x32xf32>
    %275 = arith.index_cast %c5_i32 : i32 to index
    %c0_108 = arith.constant 0 : index
    %c0_109 = arith.constant 0 : index
    %276 = vector.load %arg5[%275, %c0_108, %c0_109] : memref<8x8x32xf32, #tpu.memory_space<vmem>>, vector<1x8x32xf32>
    %277 = vector.shape_cast %276 : vector<1x8x32xf32> to vector<8x32xf32>
    %278 = vector.shape_cast %274 : vector<8x32xf32> to vector<1x8x32xf32>
    tpu.vector_store %arg5[%275, %c0_108, %c0_109], %278 {strides = array<i32>} : memref<8x8x32xf32, #tpu.memory_space<vmem>>, vector<1x8x32xf32>,
    %c6_i32 = arith.constant 6 : i32
    %279 = arith.index_cast %c6_i32 : i32 to index
    %c0_110 = arith.constant 0 : index
    %c0_111 = arith.constant 0 : index
    %280 = vector.load %arg0[%279, %c0_110, %c0_111] : memref<8x8x32xf32, #tpu.memory_space<vmem>>, vector<1x8x32xf32>
    %281 = vector.shape_cast %280 : vector<1x8x32xf32> to vector<8x32xf32>
    %cst_112 = arith.constant dense<0.000000e+00> : vector<8x32xf32>
    %282 = tpu.matmul %274, %1, %cst_112 {dimension_numbers = #tpu.dot_dimension_numbers<[1], [0], [0], [1], [0, 0, 1, 1], [], []>} : vector<8x32xf32>, vector<32x32xf32>, vector<8x32xf32> -> vector<8x32xf32>
    %283 = arith.addf %281, %282 : vector<8x32xf32>
    %284 = arith.negf %283 : vector<8x32xf32>
    %285 = math.exp %284 : vector<8x32xf32>
    %cst_113 = arith.constant 1.000000e+00 : f32
    %286 = vector.broadcast %cst_113 : f32 to vector<8x32xf32>
    %287 = arith.addf %286, %285 : vector<8x32xf32>
    %288 = arith.divf %286, %287 : vector<8x32xf32>
    %289 = arith.index_cast %c6_i32 : i32 to index
    %c0_114 = arith.constant 0 : index
    %c0_115 = arith.constant 0 : index
    %290 = vector.load %arg1[%289, %c0_114, %c0_115] : memref<8x8x32xf32, #tpu.memory_space<vmem>>, vector<1x8x32xf32>
    %291 = vector.shape_cast %290 : vector<1x8x32xf32> to vector<8x32xf32>
    %cst_116 = arith.constant dense<0.000000e+00> : vector<8x32xf32>
    %292 = tpu.matmul %274, %3, %cst_116 {dimension_numbers = #tpu.dot_dimension_numbers<[1], [0], [0], [1], [0, 0, 1, 1], [], []>} : vector<8x32xf32>, vector<32x32xf32>, vector<8x32xf32> -> vector<8x32xf32>
    %293 = arith.addf %291, %292 : vector<8x32xf32>
    %294 = arith.negf %293 : vector<8x32xf32>
    %295 = math.exp %294 : vector<8x32xf32>
    %cst_117 = arith.constant 1.000000e+00 : f32
    %296 = vector.broadcast %cst_117 : f32 to vector<8x32xf32>
    %297 = arith.addf %296, %295 : vector<8x32xf32>
    %298 = arith.divf %296, %297 : vector<8x32xf32>
    %299 = arith.index_cast %c6_i32 : i32 to index
    %c0_118 = arith.constant 0 : index
    %c0_119 = arith.constant 0 : index
    %300 = vector.load %arg2[%299, %c0_118, %c0_119] : memref<8x8x32xf32, #tpu.memory_space<vmem>>, vector<1x8x32xf32>
    %301 = vector.shape_cast %300 : vector<1x8x32xf32> to vector<8x32xf32>
    %cst_120 = arith.constant dense<0.000000e+00> : vector<8x32xf32>
    %302 = tpu.matmul %274, %5, %cst_120 {dimension_numbers = #tpu.dot_dimension_numbers<[1], [0], [0], [1], [0, 0, 1, 1], [], []>} : vector<8x32xf32>, vector<32x32xf32>, vector<8x32xf32> -> vector<8x32xf32>
    %303 = arith.addf %301, %302 : vector<8x32xf32>
    %304 = math.tanh %303 : vector<8x32xf32>
    %305 = arith.index_cast %c6_i32 : i32 to index
    %c0_121 = arith.constant 0 : index
    %c0_122 = arith.constant 0 : index
    %306 = vector.load %arg3[%305, %c0_121, %c0_122] : memref<8x8x32xf32, #tpu.memory_space<vmem>>, vector<1x8x32xf32>
    %307 = vector.shape_cast %306 : vector<1x8x32xf32> to vector<8x32xf32>
    %cst_123 = arith.constant dense<0.000000e+00> : vector<8x32xf32>
    %308 = tpu.matmul %274, %7, %cst_123 {dimension_numbers = #tpu.dot_dimension_numbers<[1], [0], [0], [1], [0, 0, 1, 1], [], []>} : vector<8x32xf32>, vector<32x32xf32>, vector<8x32xf32> -> vector<8x32xf32>
    %309 = arith.addf %307, %308 : vector<8x32xf32>
    %310 = arith.negf %309 : vector<8x32xf32>
    %311 = math.exp %310 : vector<8x32xf32>
    %cst_124 = arith.constant 1.000000e+00 : f32
    %312 = vector.broadcast %cst_124 : f32 to vector<8x32xf32>
    %313 = arith.addf %312, %311 : vector<8x32xf32>
    %314 = arith.divf %312, %313 : vector<8x32xf32>
    %315 = arith.mulf %298, %272 : vector<8x32xf32>
    %316 = arith.mulf %288, %304 : vector<8x32xf32>
    %317 = arith.addf %315, %316 : vector<8x32xf32>
    %318 = math.tanh %317 : vector<8x32xf32>
    %319 = arith.mulf %314, %318 : vector<8x32xf32>
    %320 = arith.index_cast %c6_i32 : i32 to index
    %c0_125 = arith.constant 0 : index
    %c0_126 = arith.constant 0 : index
    %321 = vector.load %arg5[%320, %c0_125, %c0_126] : memref<8x8x32xf32, #tpu.memory_space<vmem>>, vector<1x8x32xf32>
    %322 = vector.shape_cast %321 : vector<1x8x32xf32> to vector<8x32xf32>
    %323 = vector.shape_cast %319 : vector<8x32xf32> to vector<1x8x32xf32>
    tpu.vector_store %arg5[%320, %c0_125, %c0_126], %323 {strides = array<i32>} : memref<8x8x32xf32, #tpu.memory_space<vmem>>, vector<1x8x32xf32>,
    %c7_i32 = arith.constant 7 : i32
    %324 = arith.index_cast %c7_i32 : i32 to index
    %c0_127 = arith.constant 0 : index
    %c0_128 = arith.constant 0 : index
    %325 = vector.load %arg0[%324, %c0_127, %c0_128] : memref<8x8x32xf32, #tpu.memory_space<vmem>>, vector<1x8x32xf32>
    %326 = vector.shape_cast %325 : vector<1x8x32xf32> to vector<8x32xf32>
    %cst_129 = arith.constant dense<0.000000e+00> : vector<8x32xf32>
    %327 = tpu.matmul %319, %1, %cst_129 {dimension_numbers = #tpu.dot_dimension_numbers<[1], [0], [0], [1], [0, 0, 1, 1], [], []>} : vector<8x32xf32>, vector<32x32xf32>, vector<8x32xf32> -> vector<8x32xf32>
    %328 = arith.addf %326, %327 : vector<8x32xf32>
    %329 = arith.negf %328 : vector<8x32xf32>
    %330 = math.exp %329 : vector<8x32xf32>
    %cst_130 = arith.constant 1.000000e+00 : f32
    %331 = vector.broadcast %cst_130 : f32 to vector<8x32xf32>
    %332 = arith.addf %331, %330 : vector<8x32xf32>
    %333 = arith.divf %331, %332 : vector<8x32xf32>
    %334 = arith.index_cast %c7_i32 : i32 to index
    %c0_131 = arith.constant 0 : index
    %c0_132 = arith.constant 0 : index
    %335 = vector.load %arg1[%334, %c0_131, %c0_132] : memref<8x8x32xf32, #tpu.memory_space<vmem>>, vector<1x8x32xf32>
    %336 = vector.shape_cast %335 : vector<1x8x32xf32> to vector<8x32xf32>
    %cst_133 = arith.constant dense<0.000000e+00> : vector<8x32xf32>
    %337 = tpu.matmul %319, %3, %cst_133 {dimension_numbers = #tpu.dot_dimension_numbers<[1], [0], [0], [1], [0, 0, 1, 1], [], []>} : vector<8x32xf32>, vector<32x32xf32>, vector<8x32xf32> -> vector<8x32xf32>
    %338 = arith.addf %336, %337 : vector<8x32xf32>
    %339 = arith.negf %338 : vector<8x32xf32>
    %340 = math.exp %339 : vector<8x32xf32>
    %cst_134 = arith.constant 1.000000e+00 : f32
    %341 = vector.broadcast %cst_134 : f32 to vector<8x32xf32>
    %342 = arith.addf %341, %340 : vector<8x32xf32>
    %343 = arith.divf %341, %342 : vector<8x32xf32>
    %344 = arith.index_cast %c7_i32 : i32 to index
    %c0_135 = arith.constant 0 : index
    %c0_136 = arith.constant 0 : index
    %345 = vector.load %arg2[%344, %c0_135, %c0_136] : memref<8x8x32xf32, #tpu.memory_space<vmem>>, vector<1x8x32xf32>
    %346 = vector.shape_cast %345 : vector<1x8x32xf32> to vector<8x32xf32>
    %cst_137 = arith.constant dense<0.000000e+00> : vector<8x32xf32>
    %347 = tpu.matmul %319, %5, %cst_137 {dimension_numbers = #tpu.dot_dimension_numbers<[1], [0], [0], [1], [0, 0, 1, 1], [], []>} : vector<8x32xf32>, vector<32x32xf32>, vector<8x32xf32> -> vector<8x32xf32>
    %348 = arith.addf %346, %347 : vector<8x32xf32>
    %349 = math.tanh %348 : vector<8x32xf32>
    %350 = arith.index_cast %c7_i32 : i32 to index
    %c0_138 = arith.constant 0 : index
    %c0_139 = arith.constant 0 : index
    %351 = vector.load %arg3[%350, %c0_138, %c0_139] : memref<8x8x32xf32, #tpu.memory_space<vmem>>, vector<1x8x32xf32>
    %352 = vector.shape_cast %351 : vector<1x8x32xf32> to vector<8x32xf32>
    %cst_140 = arith.constant dense<0.000000e+00> : vector<8x32xf32>
    %353 = tpu.matmul %319, %7, %cst_140 {dimension_numbers = #tpu.dot_dimension_numbers<[1], [0], [0], [1], [0, 0, 1, 1], [], []>} : vector<8x32xf32>, vector<32x32xf32>, vector<8x32xf32> -> vector<8x32xf32>
    %354 = arith.addf %352, %353 : vector<8x32xf32>
    %355 = arith.negf %354 : vector<8x32xf32>
    %356 = math.exp %355 : vector<8x32xf32>
    %cst_141 = arith.constant 1.000000e+00 : f32
    %357 = vector.broadcast %cst_141 : f32 to vector<8x32xf32>
    %358 = arith.addf %357, %356 : vector<8x32xf32>
    %359 = arith.divf %357, %358 : vector<8x32xf32>
    %360 = arith.mulf %343, %317 : vector<8x32xf32>
    %361 = arith.mulf %333, %349 : vector<8x32xf32>
    %362 = arith.addf %360, %361 : vector<8x32xf32>
    %363 = math.tanh %362 : vector<8x32xf32>
    %364 = arith.mulf %359, %363 : vector<8x32xf32>
    %365 = arith.index_cast %c7_i32 : i32 to index
    %c0_142 = arith.constant 0 : index
    %c0_143 = arith.constant 0 : index
    %366 = vector.load %arg5[%365, %c0_142, %c0_143] : memref<8x8x32xf32, #tpu.memory_space<vmem>>, vector<1x8x32xf32>
    %367 = vector.shape_cast %366 : vector<1x8x32xf32> to vector<8x32xf32>
    %368 = vector.shape_cast %364 : vector<8x32xf32> to vector<1x8x32xf32>
    tpu.vector_store %arg5[%365, %c0_142, %c0_143], %368 {strides = array<i32>} : memref<8x8x32xf32, #tpu.memory_space<vmem>>, vector<1x8x32xf32>,
    %c8_i32 = arith.constant 8 : i32
    return
  }
}

</mosaic_0001>

<bundles_post_ra>
// kernel: lstm_regressor_forward.1
= control target key start
LH: loop header
LB: loop body
LE: loop exit
PB: predicated region body
PF: predicated region fallthrough
CT: control target
= control target key end

     0   :  { %10 = vsyncpa [#allocation3], 0  ;;  %s4143_s0 = inlined_call_operand.hbm [shape: f32[8,8,32], index: 0, kind: input, shape index: {}]   ;;  %s4144_s1 = inlined_call_operand.hbm [shape: f32[8,8,32], index: 1, kind: input, shape index: {}]   ;;  %s4145_s2 = inlined_call_operand.hbm [shape: f32[8,8,32], index: 2, kind: input, shape index: {}]   ;;  %s4146_s3 = inlined_call_operand.hbm [shape: f32[8,8,32], index: 3, kind: input, shape index: {}]   ;;  %s4147_s4 = inlined_call_operand.hbm [shape: f32[4,32,32], index: 4, kind: input, shape index: {}]   ;;  %s4148_s5 = inlined_call_operand.hbm [shape: f32[8,8,32], index: 5, kind: output, shape index: {}]  }
   0x1   :  { %11 = vsyncpa [#allocation6], 0 }
   0x2   :  { %12 = vsyncpa [#allocation9], 0 }
   0x3   :  { %13 = vsyncpa [#allocation4], 0  ;;  %s3726_s18 = smov [#allocation5]   ;;  %s3727_s20 = smov [#allocation8]  }
   0x4   :  { %s31_s19 = sshll.u32 %s3726_s18, 4  ;;  %s55_s21 = sshll.u32 %s3727_s20, 4  ;;  %s32_s19 = int_to_ptr.vmem [resolvable:$true] %s31_s19  ;;  %s3767_s21 = int_to_ptr.vmem [resolvable:$true] %s55_s21 }
   0x5   :  { %s3586_s24 = scalar_lea.hbm %s4144_s1, 1024 }
   0x6   :  { %p3587_p0 = scmp.ne.s32.totalorder %s4144_s1, %s3586_s24  ;;  %p3590_p1 = scmp.lt.u32.totalorder %s3586_s24, %s4144_s1 }
   0x8   :  { %p3592_p2 = pnand %p3590_p1, %p3587_p0 }
   0xa   :  { %3595 = shalt.err (!%p3592_p2)
}
   0xb   :  { %s3596_s29 = scalar_lea.vmem %s32_s19, 1024  ;;  %p3601_p4 = scmp.lt.s32.totalorder %s32_s19, %s32_s19 }
   0xc   :  { %p3597_p3 = scmp.ne.s32.totalorder %s32_s19, %s3596_s29  ;;  %p3602_p5 = scmp.lt.s32.totalorder %s3596_s29, %s3596_s29 }
   0xe   :  { %p3603_p6 = por %p3602_p5, %p3601_p4 }
  0x10   :  { %p3604_p7 = pnand %p3603_p6, %p3597_p3 }
  0x12   :  { %3607 = shalt.err (!%p3604_p7)
}
  0x13   :  { %s3728_s30 = smov 128   ;;  %s3729_s6 = smov 8  }
  0x14   :  { %37 = dma.hbm_to_vmem [thread:$0]  %s4144_s1, 1024, %s32_s19, [#allocation6], %s3728_s30, %s3728_s30, %s3729_s6  }
  0x15   :  { %s3608_s11 = scalar_lea.hbm %s4146_s3, 1024 }
  0x16   :  { %p3609_p8 = scmp.ne.s32.totalorder %s4146_s3, %s3608_s11  ;;  %p3612_p9 = scmp.lt.u32.totalorder %s3608_s11, %s4146_s3 }
  0x18   :  { %p3614_p10 = pnand %p3612_p9, %p3609_p8 }
  0x1a   :  { %3617 = shalt.err (!%p3614_p10)
}
  0x1b   :  { %s3618_s16 = scalar_lea.vmem %s3767_s21, 1024  ;;  %p3623_p12 = scmp.lt.s32.totalorder %s3767_s21, %s3767_s21 }
  0x1c   :  { %p3619_p11 = scmp.ne.s32.totalorder %s3767_s21, %s3618_s16  ;;  %p3624_p13 = scmp.lt.s32.totalorder %s3618_s16, %s3618_s16 }
  0x1e   :  { %p3625_p0 = por %p3624_p13, %p3623_p12 }
  0x20   :  { %p3626_p1 = pnand %p3625_p0, %p3619_p11 }
  0x22   :  { %3629 = shalt.err (!%p3626_p1)
}
  0x23   :  { %61 = dma.hbm_to_vmem [thread:$0]  %s4146_s3, 1024, %s3767_s21, [#allocation9], %s3728_s30, %s3728_s30, %s3729_s6  }
  0x24   :  { %s3730_s18 = smov [#allocation2]   ;;  %s3731_s20 = smov [#allocation7]  }
  0x25   :  { %s19_s19 = sshll.u32 %s3730_s18, 4  ;;  %s43_s22 = sshll.u32 %s3731_s20, 4  ;;  %s20_s19 = int_to_ptr.vmem [resolvable:$true] %s19_s19  ;;  %s3804_s22 = int_to_ptr.vmem [resolvable:$true] %s43_s22 }
  0x26   :  { %s3630_s25 = scalar_lea.hbm %s4143_s0, 1024 }
  0x27   :  { %p3631_p2 = scmp.ne.s32.totalorder %s4143_s0, %s3630_s25  ;;  %p3634_p3 = scmp.lt.u32.totalorder %s3630_s25, %s4143_s0 }
  0x29   :  { %p3636_p4 = pnand %p3634_p3, %p3631_p2 }
  0x2b   :  { %3639 = shalt.err (!%p3636_p4)
}
  0x2c   :  { %s3640_s3 = scalar_lea.vmem %s20_s19, 1024  ;;  %p3645_p6 = scmp.lt.s32.totalorder %s20_s19, %s20_s19 }
  0x2d   :  { %p3641_p5 = scmp.ne.s32.totalorder %s20_s19, %s3640_s3  ;;  %p3646_p7 = scmp.lt.s32.totalorder %s3640_s3, %s3640_s3 }
  0x2f   :  { %p3647_p8 = por %p3646_p7, %p3645_p6 }
  0x31   :  { %p3648_p9 = pnand %p3647_p8, %p3641_p5 }
  0x33   :  { %3651 = shalt.err (!%p3648_p9)
}
  0x34   :  { %25 = dma.hbm_to_vmem [thread:$0]  %s4143_s0, 1024, %s20_s19, [#allocation3], %s3728_s30, %s3728_s30, %s3729_s6  }
  0x35   :  { %s3652_s10 = scalar_lea.hbm %s4145_s2, 1024 }
  0x36   :  { %p3653_p10 = scmp.ne.s32.totalorder %s4145_s2, %s3652_s10  ;;  %p3656_p11 = scmp.lt.u32.totalorder %s3652_s10, %s4145_s2 }
  0x38   :  { %p3658_p12 = pnand %p3656_p11, %p3653_p10 }
  0x3a   :  { %3661 = shalt.err (!%p3658_p12)
}
  0x3b   :  { %s3662_s15 = scalar_lea.vmem %s3804_s22, 1024  ;;  %p3667_p0 = scmp.lt.s32.totalorder %s3804_s22, %s3804_s22 }
  0x3c   :  { %p3663_p13 = scmp.ne.s32.totalorder %s3804_s22, %s3662_s15  ;;  %p3668_p1 = scmp.lt.s32.totalorder %s3662_s15, %s3662_s15 }
  0x3e   :  { %p3669_p2 = por %p3668_p1, %p3667_p0 }
  0x40   :  { %p3670_p3 = pnand %p3669_p2, %p3663_p13 }
  0x42   :  { %3673 = shalt.err (!%p3670_p3)
}
  0x43   :  { %49 = dma.hbm_to_vmem [thread:$0]  %s4145_s2, 1024, %s3804_s22, [#allocation6], %s3728_s30, %s3728_s30, %s3729_s6  }
  0x44   :  { %s3732_s1 = smov [#allocation10]   ;;  %s3674_s20 = scalar_lea.hbm %s4147_s4, 2048 }
  0x45   :  { %s67_s17 = sshll.u32 %s3732_s1, 4  ;;  %p3675_p4 = scmp.ne.s32.totalorder %s4147_s4, %s3674_s20  ;;  %s68_s17 = int_to_ptr.vmem [resolvable:$true] %s67_s17 }
  0x46   :  { %p3678_p5 = scmp.lt.u32.totalorder %s3674_s20, %s4147_s4 }
  0x48   :  { %p3680_p6 = pnand %p3678_p5, %p3675_p4 }
  0x4a   :  { %3683 = shalt.err (!%p3680_p6)
}
  0x4b   :  { %s3684_s27 = scalar_lea.vmem %s68_s17, 2048  ;;  %p3689_p8 = scmp.lt.s32.totalorder %s68_s17, %s68_s17 }
  0x4c   :  { %p3685_p7 = scmp.ne.s32.totalorder %s68_s17, %s3684_s27  ;;  %p3690_p9 = scmp.lt.s32.totalorder %s3684_s27, %s3684_s27 }
  0x4e   :  { %p3691_p10 = por %p3690_p9, %p3689_p8 }
  0x50   :  { %p3692_p11 = pnand %p3691_p10, %p3685_p7 }
  0x52   :  { %3695 = shalt.err (!%p3692_p11)
}
  0x53   :  { %73 = dma.hbm_to_vmem [thread:$0]  %s4147_s4, 2048, %s68_s17, [#allocation9], %s3728_s30, %s3728_s30, %s3729_s6  }
  0x54   :  { %3718 = dma.done.wait [#allocation3], 1024  }
  0x55   :  { %3719 = vsyncadd [#allocation3], 4294966272 }
  0x56   :  { %3720 = dma.done.wait [#allocation6], 2048  }
  0x57   :  { %3721 = vsyncadd [#allocation6], 4294965248 }
  0x58   :  { %3722 = dma.done.wait [#allocation9], 3072  }
  0x59   :  { %3723 = vsyncadd [#allocation9], 4294964224  ;;  %v3733_v0 = vmov 0.0|0.0   ;;  %vm3734_vm0 = vmmov 0   ;;  %v3735_v1 = vmov 0.0   ;;  %v89_v2 = vld [vmem:[#allocation10] sm:$0xff] }
  0x5a   :  { %3255 = vmatprep.subr.bf16.mxu0 %v3733_v0  ;;  %3261 = vmatprep.subr.bf16.mxu1 %v3733_v0  ;;  %v90_v3 = vld [vmem:[#allocation10 + $0x8] sm:$0xff]  ;;  %v94_v4 = vld [vmem:[#allocation10 + $0x20] sm:$0xff]  ;;  %v91_v7 = vld [vmem:[#allocation10 + $0x10] sm:$0xff]  ;;  %vm109_vm1 = vcmask 261120   ;;  %s3736_s4 = smov [#allocation11]  }
  0x5b   :  { %2911 = vmatprep.mubr.msk.f32.mxu0 %vm3734_vm0, %v3735_v1  ;;  %2922 = vmatprep.mubr.msk.f32.mxu1 %vm3734_vm0, %v3735_v1  ;;  %v3862_v5 = vpack.c.bf16 %v90_v3, %v89_v2  ;;  %v95_v6 = vld [vmem:[#allocation10 + $0x28] sm:$0xff]  ;;  %v92_v8 = vld [vmem:[#allocation10 + $0x18] sm:$0xff]  ;;  %v96_v10 = vld [vmem:[#allocation10 + $0x30] sm:$0xff]  ;;  %s2677_s28 = sshll.u32 %s3736_s4, 4  ;;  %s2678_s28 = int_to_ptr.vmem [resolvable:$true] %s2677_s28 }
  0x5c   :  { %v3864_v9 = vpack.c.bf16 %v95_v6, %v94_v4  ;;  %v97_v11 = vld [vmem:[#allocation10 + $0x38] sm:$0xff]  ;;  %v3867_v12 = vpack.c.bf16 %v92_v8, %v91_v7  ;;  %v99_v14 = vld [vmem:[#allocation10 + $0x40] sm:$0xff]  ;;  %v100_v15 = vld [vmem:[#allocation10 + $0x48] sm:$0xff]  ;;  %s3696_s29 = scalar_lea.vmem %s2678_s28, 1024  ;;  %p3701_p13 = scmp.lt.s32.totalorder %s2678_s28, %s2678_s28 }
  0x5d   :  { %3257 = vmatpush3.bf16.msra.mxu0 %v3862_v5  ;;  %v3871_v13 = vpack.c.bf16 %v97_v11, %v96_v10  ;;  %v104_v16 = vld [vmem:[#allocation10 + $0x60] sm:$0xff]  ;;  %v105_v17 = vld [vmem:[#allocation10 + $0x68] sm:$0xff]  ;;  %v3875_v18 = vpack.c.bf16 %v100_v15, %v99_v14  ;;  %v101_v20 = vld [vmem:[#allocation10 + $0x50] sm:$0xff]  ;;  %p3697_p12 = scmp.ne.s32.totalorder %s2678_s28, %s3696_s29  ;;  %p3702_p0 = scmp.lt.s32.totalorder %s3696_s29, %s3696_s29 }
  0x5e   :  { %3263 = vmatpush3.bf16.msra.mxu1 %v3864_v9  ;;  %3258 = vmatprep.subr.bf16.mxu0 %v3733_v0  ;;  %v3879_v19 = vpack.c.bf16 %v105_v17, %v104_v16  ;;  %v102_v21 = vld [vmem:[#allocation10 + $0x58] sm:$0xff]  ;;  %v106_v22 = vld [vmem:[#allocation10 + $0x70] sm:$0xff]  ;;  %v108_v26 = vld [vmem:[#allocation2] sm:$0xff] }
  0x5f   :  { %3264 = vmatprep.subr.bf16.mxu1 %v3733_v0  ;;  %v107_v23 = vld [vmem:[#allocation10 + $0x78] sm:$0xff]  ;;  %v3885_v24 = vpack.c.bf16 %v102_v21, %v101_v20  ;;  %v190_v27 = vld [vmem:[#allocation5] sm:$0xff]  ;;  %v426_v60 = vld [vmem:[#allocation2 + $0x8] sm:$0xff]  ;;  %p3703_p1 = por %p3702_p0, %p3701_p13 }
  0x60   :  { %v3889_v25 = vpack.c.bf16 %v107_v23, %v106_v22  ;;  %v341_v36 = vld [vmem:[#allocation8] sm:$0xff]  ;;  %v508_v61 = vld [vmem:[#allocation5 + $0x8] sm:$0xff] }
  0x61   :  { %3260 = vmatpush3.bf16.msra.mxu0 %v3867_v12  ;;  %v268_v38 = vld [vmem:[#allocation7] sm:$0xff]  ;;  %v661_v10 = vld [vmem:[#allocation8 + $0x8] sm:$0xff]  ;;  %p3704_p2 = pnand %p3703_p1, %p3697_p12 }
  0x62   :  { %3266 = vmatpush3.bf16.msra.mxu1 %v3871_v13  ;;  %3267 = vmatprep.subr.bf16.mxu0 %v3733_v0  ;;  %v587_v20 = vld [vmem:[#allocation7 + $0x8] sm:$0xff] }
  0x63   :  { %3273 = vmatprep.subr.bf16.mxu1 %v3733_v0 }
  0x64   :  { %2912 = vmatmul.mubr.f32.vlgmr.msra.gmra.mrb[0].mxu0 %v3735_v1 }
  0x65   :  { %2923 = vmatmul.mubr.f32.vlgmr.msra.gmra.mrb[0].mxu1 %v3735_v1  ;;  %3269 = vmatpush3.bf16.msra.mxu0 %v3875_v18 }
  0x66   :  { %3275 = vmatpush3.bf16.msra.mxu1 %v3879_v19  ;;  %3270 = vmatprep.subr.bf16.mxu0 %v3733_v0 }
  0x67   :  { %3276 = vmatprep.subr.bf16.mxu1 %v3733_v0  ;;  %2933 = vmatprep.mubr.msk.f32.mxu0 %vm3734_vm0, %v3735_v1 }
  0x68   :  { %2944 = vmatprep.mubr.msk.f32.mxu1 %vm3734_vm0, %v3735_v1 }
  0x69   :  { %3272 = vmatpush3.bf16.msra.mxu0 %v3885_v24 }
  0x6a   :  { %3278 = vmatpush3.bf16.msra.mxu1 %v3889_v25  ;;  %3279 = vmatprep.subr.bf16.mxu0 %v3733_v0 }
  0x6b   :  { %3285 = vmatprep.subr.bf16.mxu1 %v3733_v0 }
  0x6c   :  { %2934 = vmatmul.mubr.f32.vlgmr.msra.gmra.mrb[2].mxu0 %v3735_v1 }
  0x6d   :  { %2945 = vmatmul.mubr.f32.vlgmr.msra.gmra.mrb[2].mxu1 %v3735_v1  ;;  %3281 = vmatpush3.bf16.msra.mxu0 %v3862_v5 }
  0x6e   :  { %3287 = vmatpush3.bf16.msra.mxu1 %v3864_v9  ;;  %3282 = vmatprep.subr.bf16.mxu0 %v3733_v0 }
  0x6f   :  { %3288 = vmatprep.subr.bf16.mxu1 %v3733_v0  ;;  %2955 = vmatprep.mubr.msk.f32.mxu0 %vm3734_vm0, %v3735_v1 }
  0x70   :  { %2966 = vmatprep.mubr.msk.f32.mxu1 %vm3734_vm0, %v3735_v1 }
  0x71   :  { %3284 = vmatpush3.bf16.msra.mxu0 %v3867_v12 }
  0x72   :  { %3290 = vmatpush3.bf16.msra.mxu1 %v3871_v13  ;;  %3291 = vmatprep.subr.bf16.mxu0 %v3733_v0 }
  0x73   :  { %3297 = vmatprep.subr.bf16.mxu1 %v3733_v0 }
 0x137   :  { %v179_v28 = vpop.f32.mrb[0].mxu0 }
 0x138   :  { %v183_v29 = vadd.f32 %v179_v28, %v108_v26  ;;  %v257_v30 = vpop.f32.mrb[0].mxu1  ;;  %v2913_v31 = vpop.f32.mrb[1].mxu0 }
 0x139   :  { %v261_v32 = vadd.f32 %v257_v30, %v190_v27  ;;  %v2924_v33 = vpop.f32.mrb[1].mxu1 }
 0x13a   :  { %v2691_v34 = vmul.f32 -1.442695, %v183_v29 }
 0x13b   :  { %v2692_v35 = vmul.f32 -1.442695, %v261_v32 }
 0x13c   :  { %3458 = vpow2.f32 %v2691_v34 }
 0x13d   :  { %3460 = vpow2.f32 %v2692_v35 }
 0x13f   :  { %v335_v37 = vpop.f32.mrb[2].mxu0 }
 0x140   :  { %v408_v39 = vpop.f32.mrb[2].mxu1  ;;  %v2935_v40 = vpop.f32.mrb[3].mxu0  ;;  %v339_v43 = vadd.f32 %v335_v37, %v268_v38 }
 0x141   :  { %v412_v41 = vadd.f32 %v408_v39, %v341_v36  ;;  %v2946_v42 = vpop.f32.mrb[3].mxu1  ;;  %v747_v40 = vld [vmem:[#allocation2 + $0x10] sm:$0xff] }
 0x143   :  { %v2693_v44 = vmul.f32 -1.442695, %v412_v41  ;;  %v829_v41 = vld [vmem:[#allocation5 + $0x10] sm:$0xff] }
 0x145   :  { %3462 = vpow2.f32 %v2693_v44 }
 0x146   :  { %v3459_v45 = vpop.eup %3458  ;;  %3464 = vtanh.f32 %v339_v43 }
 0x147   :  { %v3461_v46 = vpop.eup %3460  ;;  %v187_v47 = vadd.f32 1.0, %v3459_v45 }
 0x148   :  { %v265_v48 = vadd.f32 1.0, %v3461_v46 }
 0x149   :  { %3466 = vrcp.f32 %v187_v47 }
 0x14a   :  { %3468 = vrcp.f32 %v265_v48 }
 0x14f   :  { %v3463_v49 = vpop.eup %3462 }
 0x150   :  { %v3465_v50 = vpop.eup %3464  ;;  %v416_v52 = vadd.f32 1.0, %v3463_v49 }
 0x152   :  { %3470 = vrcp.f32 %v416_v52 }
 0x153   :  { %v3467_v51 = vpop.eup %3466 }
 0x154   :  { %v3469_v53 = vpop.eup %3468  ;;  %v420_v54 = vmul.f32 %v3467_v51, %v3465_v50  ;;  %v982_v50 = vld [vmem:[#allocation8 + $0x10] sm:$0xff] }
 0x155   :  { %v419_v55 = vmul.f32 0.0, %v3469_v53 }
 0x157   :  { %v3914_v56 = vadd.f32 %v420_v54, %v419_v55 }
 0x159   :  { %3472 = vtanh.f32 %v3914_v56 }
 0x15c   :  { %v3471_v57 = vpop.eup %3470 }
 0x163   :  { %v3473_v58 = vpop.eup %3472 }
 0x164   :  { %v423_v59 = vmul.f32 %v3473_v58, %v3471_v57 }
 0x166   :  { %2956 = vmatmul.mubr.msk.f32.vlgmr.msra.gmra.mrb[4].mxu0 %vm109_vm1, %v423_v59  ;;  %424 = vst.msk [vmem:[#allocation11] sm:$0xff] %vm109_vm1, %v423_v59  ;;  %2967 = vmatmul.mubr.msk.f32.vlgmr.msra.gmra.mrb[4].mxu1 %vm109_vm1, %v423_v59 }
 0x167   :  { %3293 = vmatpush3.bf16.msra.mxu0 %v3875_v18  ;;  %3299 = vmatpush3.bf16.msra.mxu1 %v3879_v19 }
 0x168   :  { %3294 = vmatprep.subr.bf16.mxu0 %v3733_v0  ;;  %3300 = vmatprep.subr.bf16.mxu1 %v3733_v0 }
 0x169   :  { %2977 = vmatprep.mubr.msk.f32.mxu0 %vm3734_vm0, %v3735_v1  ;;  %2988 = vmatprep.mubr.msk.f32.mxu1 %vm3734_vm0, %v3735_v1 }
 0x16b   :  { %3296 = vmatpush3.bf16.msra.mxu0 %v3885_v24  ;;  %3302 = vmatpush3.bf16.msra.mxu1 %v3889_v25 }
 0x16c   :  { %3303 = vmatprep.subr.bf16.mxu0 %v3733_v0  ;;  %3309 = vmatprep.subr.bf16.mxu1 %v3733_v0 }
 0x16e   :  { %2978 = vmatmul.mubr.msk.f32.vlgmr.msra.gmra.mrb[6].mxu0 %vm109_vm1, %v423_v59  ;;  %2989 = vmatmul.mubr.msk.f32.vlgmr.msra.gmra.mrb[6].mxu1 %vm109_vm1, %v423_v59 }
 0x16f   :  { %3305 = vmatpush3.bf16.msra.mxu0 %v3862_v5  ;;  %3311 = vmatpush3.bf16.msra.mxu1 %v3864_v9 }
 0x170   :  { %3306 = vmatprep.subr.bf16.mxu0 %v3733_v0  ;;  %3312 = vmatprep.subr.bf16.mxu1 %v3733_v0 }
 0x171   :  { %2999 = vmatprep.mubr.msk.f32.mxu0 %vm3734_vm0, %v3735_v1  ;;  %3010 = vmatprep.mubr.msk.f32.mxu1 %vm3734_vm0, %v3735_v1 }
 0x173   :  { %3308 = vmatpush3.bf16.msra.mxu0 %v3867_v12  ;;  %3314 = vmatpush3.bf16.msra.mxu1 %v3871_v13 }
 0x174   :  { %3315 = vmatprep.subr.bf16.mxu0 %v3733_v0  ;;  %3321 = vmatprep.subr.bf16.mxu1 %v3733_v0 }
 0x239   :  { %v496_v62 = vpop.f32.mrb[4].mxu0  ;;  %v575_v63 = vpop.f32.mrb[4].mxu1 }
 0x23a   :  { %v500_v2 = vadd.f32 %v496_v62, %v426_v60  ;;  %v579_v3 = vadd.f32 %v575_v63, %v508_v61  ;;  %v2957_v4 = vpop.f32.mrb[5].mxu0  ;;  %v2968_v6 = vpop.f32.mrb[5].mxu1 }
 0x23c   :  { %v2695_v7 = vmul.f32 -1.442695, %v500_v2  ;;  %v2697_v8 = vmul.f32 -1.442695, %v579_v3 }
 0x23e   :  { %3474 = vpow2.f32 %v2695_v7 }
 0x23f   :  { %3476 = vpow2.f32 %v2697_v8 }
 0x241   :  { %v654_v11 = vpop.f32.mrb[6].mxu0  ;;  %v728_v14 = vpop.f32.mrb[6].mxu1 }
 0x242   :  { %v732_v15 = vadd.f32 %v728_v14, %v661_v10  ;;  %v2979_v16 = vpop.f32.mrb[7].mxu0  ;;  %v2990_v17 = vpop.f32.mrb[7].mxu1  ;;  %v658_v22 = vadd.f32 %v654_v11, %v587_v20 }
 0x243   :  { %v1068_v16 = vld [vmem:[#allocation2 + $0x18] sm:$0xff] }
 0x244   :  { %v2700_v21 = vmul.f32 -1.442695, %v732_v15  ;;  %v1150_v17 = vld [vmem:[#allocation5 + $0x18] sm:$0xff] }
 0x246   :  { %3478 = vpow2.f32 %v2700_v21 }
 0x247   :  { %3480 = vtanh.f32 %v658_v22 }
 0x248   :  { %v3475_v23 = vpop.eup %3474 }
 0x249   :  { %v3477_v26 = vpop.eup %3476  ;;  %v504_v27 = vadd.f32 1.0, %v3475_v23 }
 0x24a   :  { %v583_v28 = vadd.f32 1.0, %v3477_v26 }
 0x24b   :  { %3482 = vrcp.f32 %v504_v27 }
 0x24c   :  { %3484 = vrcp.f32 %v583_v28 }
 0x250   :  { %v3479_v29 = vpop.eup %3478 }
 0x251   :  { %v3481_v30 = vpop.eup %3480  ;;  %v736_v34 = vadd.f32 1.0, %v3479_v29 }
 0x253   :  { %3486 = vrcp.f32 %v736_v34 }
 0x255   :  { %v3483_v31 = vpop.eup %3482 }
 0x256   :  { %v3485_v32 = vpop.eup %3484  ;;  %v740_v33 = vmul.f32 %v3483_v31, %v3481_v30  ;;  %v1303_v30 = vld [vmem:[#allocation8 + $0x18] sm:$0xff] }
 0x257   :  { %v739_v35 = vmul.f32 %v3485_v32, %v3914_v56  ;;  %v908_v56 = vld [vmem:[#allocation7 + $0x10] sm:$0xff] }
 0x259   :  { %v3947_v36 = vadd.f32 %v740_v33, %v739_v35 }
 0x25b   :  { %3488 = vtanh.f32 %v3947_v36 }
 0x25d   :  { %v3487_v37 = vpop.eup %3486 }
 0x265   :  { %v3489_v38 = vpop.eup %3488 }
 0x266   :  { %v743_v39 = vmul.f32 %v3489_v38, %v3487_v37 }
 0x268   :  { %3000 = vmatmul.mubr.msk.f32.vlgmr.msra.gmra.mrb[8].mxu0 %vm109_vm1, %v743_v39  ;;  %745 = vst.msk [vmem:[#allocation11 + $0x8] sm:$0xff] %vm109_vm1, %v743_v39  ;;  %3011 = vmatmul.mubr.msk.f32.vlgmr.msra.gmra.mrb[8].mxu1 %vm109_vm1, %v743_v39 }
 0x269   :  { %3317 = vmatpush3.bf16.msra.mxu0 %v3875_v18  ;;  %3323 = vmatpush3.bf16.msra.mxu1 %v3879_v19 }
 0x26a   :  { %3318 = vmatprep.subr.bf16.mxu0 %v3733_v0  ;;  %3324 = vmatprep.subr.bf16.mxu1 %v3733_v0 }
 0x26b   :  { %3021 = vmatprep.mubr.msk.f32.mxu0 %vm3734_vm0, %v3735_v1  ;;  %3032 = vmatprep.mubr.msk.f32.mxu1 %vm3734_vm0, %v3735_v1 }
 0x26d   :  { %3320 = vmatpush3.bf16.msra.mxu0 %v3885_v24  ;;  %3326 = vmatpush3.bf16.msra.mxu1 %v3889_v25 }
 0x26e   :  { %3327 = vmatprep.subr.bf16.mxu0 %v3733_v0  ;;  %3333 = vmatprep.subr.bf16.mxu1 %v3733_v0 }
 0x270   :  { %3022 = vmatmul.mubr.msk.f32.vlgmr.msra.gmra.mrb[10].mxu0 %vm109_vm1, %v743_v39  ;;  %3033 = vmatmul.mubr.msk.f32.vlgmr.msra.gmra.mrb[10].mxu1 %vm109_vm1, %v743_v39 }
 0x271   :  { %3329 = vmatpush3.bf16.msra.mxu0 %v3862_v5  ;;  %3335 = vmatpush3.bf16.msra.mxu1 %v3864_v9 }
 0x272   :  { %3330 = vmatprep.subr.bf16.mxu0 %v3733_v0  ;;  %3336 = vmatprep.subr.bf16.mxu1 %v3733_v0 }
 0x273   :  { %3043 = vmatprep.mubr.msk.f32.mxu0 %vm3734_vm0, %v3735_v1  ;;  %3054 = vmatprep.mubr.msk.f32.mxu1 %vm3734_vm0, %v3735_v1 }
 0x275   :  { %3332 = vmatpush3.bf16.msra.mxu0 %v3867_v12  ;;  %3338 = vmatpush3.bf16.msra.mxu1 %v3871_v13 }
 0x276   :  { %3339 = vmatprep.subr.bf16.mxu0 %v3733_v0  ;;  %3345 = vmatprep.subr.bf16.mxu1 %v3733_v0 }
 0x33b   :  { %v817_v42 = vpop.f32.mrb[8].mxu0  ;;  %v896_v43 = vpop.f32.mrb[8].mxu1 }
 0x33c   :  { %v821_v44 = vadd.f32 %v817_v42, %v747_v40  ;;  %v900_v45 = vadd.f32 %v896_v43, %v829_v41  ;;  %v3001_v46 = vpop.f32.mrb[9].mxu0  ;;  %v3012_v47 = vpop.f32.mrb[9].mxu1 }
 0x33e   :  { %v2702_v48 = vmul.f32 -1.442695, %v821_v44  ;;  %v2704_v49 = vmul.f32 -1.442695, %v900_v45 }
 0x340   :  { %3490 = vpow2.f32 %v2702_v48 }
 0x341   :  { %3492 = vpow2.f32 %v2704_v49 }
 0x343   :  { %v975_v51 = vpop.f32.mrb[10].mxu0  ;;  %v1049_v52 = vpop.f32.mrb[10].mxu1 }
 0x344   :  { %v1053_v53 = vadd.f32 %v1049_v52, %v982_v50  ;;  %v3023_v54 = vpop.f32.mrb[11].mxu0  ;;  %v3034_v55 = vpop.f32.mrb[11].mxu1  ;;  %v979_v58 = vadd.f32 %v975_v51, %v908_v56 }
 0x345   :  { %v1389_v54 = vld [vmem:[#allocation2 + $0x20] sm:$0xff] }
 0x346   :  { %v2707_v57 = vmul.f32 -1.442695, %v1053_v53  ;;  %v1471_v55 = vld [vmem:[#allocation5 + $0x20] sm:$0xff] }
 0x348   :  { %3494 = vpow2.f32 %v2707_v57 }
 0x349   :  { %3496 = vtanh.f32 %v979_v58 }
 0x34a   :  { %v3491_v59 = vpop.eup %3490 }
 0x34b   :  { %v3493_v60 = vpop.eup %3492  ;;  %v825_v61 = vadd.f32 1.0, %v3491_v59 }
 0x34c   :  { %v904_v62 = vadd.f32 1.0, %v3493_v60 }
 0x34d   :  { %3498 = vrcp.f32 %v825_v61 }
 0x34e   :  { %3500 = vrcp.f32 %v904_v62 }
 0x352   :  { %v3495_v63 = vpop.eup %3494 }
 0x353   :  { %v3497_v2 = vpop.eup %3496  ;;  %v1057_v7 = vadd.f32 1.0, %v3495_v63 }
 0x355   :  { %3502 = vrcp.f32 %v1057_v7 }
 0x357   :  { %v3499_v3 = vpop.eup %3498 }
 0x358   :  { %v3501_v4 = vpop.eup %3500  ;;  %v1061_v6 = vmul.f32 %v3499_v3, %v3497_v2  ;;  %v1624_v2 = vld [vmem:[#allocation8 + $0x20] sm:$0xff] }
 0x359   :  { %v1060_v8 = vmul.f32 %v3501_v4, %v3947_v36  ;;  %v1229_v36 = vld [vmem:[#allocation7 + $0x18] sm:$0xff] }
 0x35b   :  { %v3980_v10 = vadd.f32 %v1061_v6, %v1060_v8 }
 0x35d   :  { %3504 = vtanh.f32 %v3980_v10 }
 0x35f   :  { %v3503_v11 = vpop.eup %3502 }
 0x367   :  { %v3505_v14 = vpop.eup %3504 }
 0x368   :  { %v1064_v15 = vmul.f32 %v3505_v14, %v3503_v11 }
 0x36a   :  { %3044 = vmatmul.mubr.msk.f32.vlgmr.msra.gmra.mrb[12].mxu0 %vm109_vm1, %v1064_v15  ;;  %1066 = vst.msk [vmem:[#allocation11 + $0x10] sm:$0xff] %vm109_vm1, %v1064_v15  ;;  %3055 = vmatmul.mubr.msk.f32.vlgmr.msra.gmra.mrb[12].mxu1 %vm109_vm1, %v1064_v15 }
 0x36b   :  { %3341 = vmatpush3.bf16.msra.mxu0 %v3875_v18  ;;  %3347 = vmatpush3.bf16.msra.mxu1 %v3879_v19 }
 0x36c   :  { %3342 = vmatprep.subr.bf16.mxu0 %v3733_v0  ;;  %3348 = vmatprep.subr.bf16.mxu1 %v3733_v0 }
 0x36d   :  { %3065 = vmatprep.mubr.msk.f32.mxu0 %vm3734_vm0, %v3735_v1  ;;  %3076 = vmatprep.mubr.msk.f32.mxu1 %vm3734_vm0, %v3735_v1 }
 0x36f   :  { %3344 = vmatpush3.bf16.msra.mxu0 %v3885_v24  ;;  %3350 = vmatpush3.bf16.msra.mxu1 %v3889_v25 }
 0x370   :  { %3351 = vmatprep.subr.bf16.mxu0 %v3733_v0  ;;  %3357 = vmatprep.subr.bf16.mxu1 %v3733_v0 }
 0x372   :  { %3066 = vmatmul.mubr.msk.f32.vlgmr.msra.gmra.mrb[14].mxu0 %vm109_vm1, %v1064_v15  ;;  %3077 = vmatmul.mubr.msk.f32.vlgmr.msra.gmra.mrb[14].mxu1 %vm109_vm1, %v1064_v15 }
 0x373   :  { %3353 = vmatpush3.bf16.msra.mxu0 %v3862_v5  ;;  %3359 = vmatpush3.bf16.msra.mxu1 %v3864_v9 }
 0x374   :  { %3354 = vmatprep.subr.bf16.mxu0 %v3733_v0  ;;  %3360 = vmatprep.subr.bf16.mxu1 %v3733_v0 }
 0x375   :  { %3087 = vmatprep.mubr.msk.f32.mxu0 %vm3734_vm0, %v3735_v1  ;;  %3098 = vmatprep.mubr.msk.f32.mxu1 %vm3734_vm0, %v3735_v1 }
 0x377   :  { %3356 = vmatpush3.bf16.msra.mxu0 %v3867_v12  ;;  %3362 = vmatpush3.bf16.msra.mxu1 %v3871_v13 }
 0x378   :  { %3363 = vmatprep.subr.bf16.mxu0 %v3733_v0  ;;  %3369 = vmatprep.subr.bf16.mxu1 %v3733_v0 }
 0x43d   :  { %v1138_v20 = vpop.f32.mrb[12].mxu0  ;;  %v1217_v21 = vpop.f32.mrb[12].mxu1 }
 0x43e   :  { %v1142_v22 = vadd.f32 %v1138_v20, %v1068_v16  ;;  %v1221_v23 = vadd.f32 %v1217_v21, %v1150_v17  ;;  %v3045_v26 = vpop.f32.mrb[13].mxu0  ;;  %v3056_v27 = vpop.f32.mrb[13].mxu1 }
 0x440   :  { %v2709_v28 = vmul.f32 -1.442695, %v1142_v22  ;;  %v2711_v29 = vmul.f32 -1.442695, %v1221_v23 }
 0x442   :  { %3506 = vpow2.f32 %v2709_v28 }
 0x443   :  { %3508 = vpow2.f32 %v2711_v29 }
 0x445   :  { %v1296_v31 = vpop.f32.mrb[14].mxu0  ;;  %v1370_v32 = vpop.f32.mrb[14].mxu1 }
 0x446   :  { %v1374_v33 = vadd.f32 %v1370_v32, %v1303_v30  ;;  %v3067_v34 = vpop.f32.mrb[15].mxu0  ;;  %v3078_v35 = vpop.f32.mrb[15].mxu1  ;;  %v1300_v38 = vadd.f32 %v1296_v31, %v1229_v36 }
 0x447   :  { %v1710_v34 = vld [vmem:[#allocation2 + $0x28] sm:$0xff] }
 0x448   :  { %v2714_v37 = vmul.f32 -1.442695, %v1374_v33  ;;  %v1792_v35 = vld [vmem:[#allocation5 + $0x28] sm:$0xff] }
 0x44a   :  { %3510 = vpow2.f32 %v2714_v37 }
 0x44b   :  { %3512 = vtanh.f32 %v1300_v38 }
 0x44c   :  { %v3507_v39 = vpop.eup %3506 }
 0x44d   :  { %v3509_v40 = vpop.eup %3508  ;;  %v1146_v41 = vadd.f32 1.0, %v3507_v39 }
 0x44e   :  { %v1225_v42 = vadd.f32 1.0, %v3509_v40 }
 0x44f   :  { %3514 = vrcp.f32 %v1146_v41 }
 0x450   :  { %3516 = vrcp.f32 %v1225_v42 }
 0x454   :  { %v3511_v43 = vpop.eup %3510 }
 0x455   :  { %v3513_v44 = vpop.eup %3512  ;;  %v1378_v48 = vadd.f32 1.0, %v3511_v43 }
 0x457   :  { %3518 = vrcp.f32 %v1378_v48 }
 0x459   :  { %v3515_v45 = vpop.eup %3514 }
 0x45a   :  { %v3517_v46 = vpop.eup %3516  ;;  %v1382_v47 = vmul.f32 %v3515_v45, %v3513_v44  ;;  %v1945_v44 = vld [vmem:[#allocation8 + $0x28] sm:$0xff] }
 0x45b   :  { %v1381_v49 = vmul.f32 %v3517_v46, %v3980_v10  ;;  %v1550_v10 = vld [vmem:[#allocation7 + $0x20] sm:$0xff] }
 0x45d   :  { %v4013_v50 = vadd.f32 %v1382_v47, %v1381_v49 }
 0x45f   :  { %3520 = vtanh.f32 %v4013_v50 }
 0x461   :  { %v3519_v51 = vpop.eup %3518 }
 0x469   :  { %v3521_v52 = vpop.eup %3520 }
 0x46a   :  { %v1385_v53 = vmul.f32 %v3521_v52, %v3519_v51 }
 0x46c   :  { %3088 = vmatmul.mubr.msk.f32.vlgmr.msra.gmra.mrb[16].mxu0 %vm109_vm1, %v1385_v53  ;;  %1387 = vst.msk [vmem:[#allocation11 + $0x18] sm:$0xff] %vm109_vm1, %v1385_v53  ;;  %3099 = vmatmul.mubr.msk.f32.vlgmr.msra.gmra.mrb[16].mxu1 %vm109_vm1, %v1385_v53 }
 0x46d   :  { %3365 = vmatpush3.bf16.msra.mxu0 %v3875_v18  ;;  %3371 = vmatpush3.bf16.msra.mxu1 %v3879_v19 }
 0x46e   :  { %3366 = vmatprep.subr.bf16.mxu0 %v3733_v0  ;;  %3372 = vmatprep.subr.bf16.mxu1 %v3733_v0 }
 0x46f   :  { %3109 = vmatprep.mubr.msk.f32.mxu0 %vm3734_vm0, %v3735_v1  ;;  %3120 = vmatprep.mubr.msk.f32.mxu1 %vm3734_vm0, %v3735_v1 }
 0x471   :  { %3368 = vmatpush3.bf16.msra.mxu0 %v3885_v24  ;;  %3374 = vmatpush3.bf16.msra.mxu1 %v3889_v25 }
 0x472   :  { %3375 = vmatprep.subr.bf16.mxu0 %v3733_v0  ;;  %3381 = vmatprep.subr.bf16.mxu1 %v3733_v0 }
 0x474   :  { %3110 = vmatmul.mubr.msk.f32.vlgmr.msra.gmra.mrb[18].mxu0 %vm109_vm1, %v1385_v53  ;;  %3121 = vmatmul.mubr.msk.f32.vlgmr.msra.gmra.mrb[18].mxu1 %vm109_vm1, %v1385_v53 }
 0x475   :  { %3377 = vmatpush3.bf16.msra.mxu0 %v3862_v5  ;;  %3383 = vmatpush3.bf16.msra.mxu1 %v3864_v9 }
 0x476   :  { %3378 = vmatprep.subr.bf16.mxu0 %v3733_v0  ;;  %3384 = vmatprep.subr.bf16.mxu1 %v3733_v0 }
 0x477   :  { %3131 = vmatprep.mubr.msk.f32.mxu0 %vm3734_vm0, %v3735_v1  ;;  %3142 = vmatprep.mubr.msk.f32.mxu1 %vm3734_vm0, %v3735_v1 }
 0x479   :  { %3380 = vmatpush3.bf16.msra.mxu0 %v3867_v12  ;;  %3386 = vmatpush3.bf16.msra.mxu1 %v3871_v13 }
 0x47a   :  { %3387 = vmatprep.subr.bf16.mxu0 %v3733_v0  ;;  %3393 = vmatprep.subr.bf16.mxu1 %v3733_v0 }
 0x53f   :  { %v1459_v56 = vpop.f32.mrb[16].mxu0  ;;  %v1538_v57 = vpop.f32.mrb[16].mxu1 }
 0x540   :  { %v1463_v58 = vadd.f32 %v1459_v56, %v1389_v54  ;;  %v1542_v59 = vadd.f32 %v1538_v57, %v1471_v55  ;;  %v3089_v60 = vpop.f32.mrb[17].mxu0  ;;  %v3100_v61 = vpop.f32.mrb[17].mxu1 }
 0x542   :  { %v2716_v62 = vmul.f32 -1.442695, %v1463_v58  ;;  %v2718_v63 = vmul.f32 -1.442695, %v1542_v59 }
 0x544   :  { %3522 = vpow2.f32 %v2716_v62 }
 0x545   :  { %3524 = vpow2.f32 %v2718_v63 }
 0x547   :  { %v1617_v3 = vpop.f32.mrb[18].mxu0  ;;  %v1691_v4 = vpop.f32.mrb[18].mxu1 }
 0x548   :  { %v1695_v6 = vadd.f32 %v1691_v4, %v1624_v2  ;;  %v3111_v7 = vpop.f32.mrb[19].mxu0  ;;  %v3122_v8 = vpop.f32.mrb[19].mxu1  ;;  %v1621_v14 = vadd.f32 %v1617_v3, %v1550_v10 }
 0x54a   :  { %v2721_v11 = vmul.f32 -1.442695, %v1695_v6 }
 0x54c   :  { %3526 = vpow2.f32 %v2721_v11 }
 0x54d   :  { %3528 = vtanh.f32 %v1621_v14 }
 0x54e   :  { %v3523_v15 = vpop.eup %3522 }
 0x54f   :  { %v3525_v16 = vpop.eup %3524  ;;  %v1467_v17 = vadd.f32 1.0, %v3523_v15 }
 0x550   :  { %v1546_v20 = vadd.f32 1.0, %v3525_v16 }
 0x551   :  { %3530 = vrcp.f32 %v1467_v17 }
 0x552   :  { %3532 = vrcp.f32 %v1546_v20  ;;  %v2266_v20 = vld [vmem:[#allocation8 + $0x30] sm:$0xff] }
 0x556   :  { %v3527_v21 = vpop.eup %3526 }
 0x557   :  { %v3529_v22 = vpop.eup %3528  ;;  %v1699_v28 = vadd.f32 1.0, %v3527_v21 }
 0x559   :  { %3534 = vrcp.f32 %v1699_v28 }
 0x55b   :  { %v3531_v23 = vpop.eup %3530 }
 0x55c   :  { %v3533_v26 = vpop.eup %3532  ;;  %v1703_v27 = vmul.f32 %v3531_v23, %v3529_v22 }
 0x55d   :  { %v1702_v29 = vmul.f32 %v3533_v26, %v4013_v50  ;;  %v1871_v50 = vld [vmem:[#allocation7 + $0x28] sm:$0xff]  ;;  %v2192_v26 = vld [vmem:[#allocation7 + $0x30] sm:$0xff] }
 0x55f   :  { %v4046_v30 = vadd.f32 %v1703_v27, %v1702_v29 }
 0x561   :  { %3536 = vtanh.f32 %v4046_v30 }
 0x563   :  { %v3535_v31 = vpop.eup %3534 }
 0x56b   :  { %v3537_v32 = vpop.eup %3536 }
 0x56c   :  { %v1706_v33 = vmul.f32 %v3537_v32, %v3535_v31 }
 0x56e   :  { %3132 = vmatmul.mubr.msk.f32.vlgmr.msra.gmra.mrb[20].mxu0 %vm109_vm1, %v1706_v33  ;;  %1708 = vst.msk [vmem:[#allocation11 + $0x20] sm:$0xff] %vm109_vm1, %v1706_v33  ;;  %3143 = vmatmul.mubr.msk.f32.vlgmr.msra.gmra.mrb[20].mxu1 %vm109_vm1, %v1706_v33 }
 0x56f   :  { %3389 = vmatpush3.bf16.msra.mxu0 %v3875_v18  ;;  %3395 = vmatpush3.bf16.msra.mxu1 %v3879_v19 }
 0x570   :  { %3390 = vmatprep.subr.bf16.mxu0 %v3733_v0  ;;  %3396 = vmatprep.subr.bf16.mxu1 %v3733_v0 }
 0x571   :  { %3153 = vmatprep.mubr.msk.f32.mxu0 %vm3734_vm0, %v3735_v1  ;;  %3164 = vmatprep.mubr.msk.f32.mxu1 %vm3734_vm0, %v3735_v1 }
 0x573   :  { %3392 = vmatpush3.bf16.msra.mxu0 %v3885_v24  ;;  %3398 = vmatpush3.bf16.msra.mxu1 %v3889_v25 }
 0x574   :  { %3399 = vmatprep.subr.bf16.mxu0 %v3733_v0  ;;  %3405 = vmatprep.subr.bf16.mxu1 %v3733_v0 }
 0x576   :  { %3154 = vmatmul.mubr.msk.f32.vlgmr.msra.gmra.mrb[22].mxu0 %vm109_vm1, %v1706_v33  ;;  %3165 = vmatmul.mubr.msk.f32.vlgmr.msra.gmra.mrb[22].mxu1 %vm109_vm1, %v1706_v33 }
 0x577   :  { %3401 = vmatpush3.bf16.msra.mxu0 %v3862_v5  ;;  %3407 = vmatpush3.bf16.msra.mxu1 %v3864_v9 }
 0x578   :  { %3402 = vmatprep.subr.bf16.mxu0 %v3733_v0  ;;  %3408 = vmatprep.subr.bf16.mxu1 %v3733_v0 }
 0x579   :  { %3175 = vmatprep.mubr.msk.f32.mxu0 %vm3734_vm0, %v3735_v1  ;;  %3186 = vmatprep.mubr.msk.f32.mxu1 %vm3734_vm0, %v3735_v1 }
 0x57b   :  { %3404 = vmatpush3.bf16.msra.mxu0 %v3867_v12  ;;  %3410 = vmatpush3.bf16.msra.mxu1 %v3871_v13 }
 0x57c   :  { %3411 = vmatprep.subr.bf16.mxu0 %v3733_v0  ;;  %3417 = vmatprep.subr.bf16.mxu1 %v3733_v0 }
 0x641   :  { %v1780_v36 = vpop.f32.mrb[20].mxu0  ;;  %v1859_v37 = vpop.f32.mrb[20].mxu1 }
 0x642   :  { %v1784_v38 = vadd.f32 %v1780_v36, %v1710_v34  ;;  %v1863_v39 = vadd.f32 %v1859_v37, %v1792_v35  ;;  %v3133_v40 = vpop.f32.mrb[21].mxu0  ;;  %v3144_v41 = vpop.f32.mrb[21].mxu1 }
 0x644   :  { %v2723_v42 = vmul.f32 -1.442695, %v1784_v38  ;;  %v2725_v43 = vmul.f32 -1.442695, %v1863_v39 }
 0x646   :  { %3538 = vpow2.f32 %v2723_v42 }
 0x647   :  { %3540 = vpow2.f32 %v2725_v43 }
 0x649   :  { %v1938_v45 = vpop.f32.mrb[22].mxu0  ;;  %v2012_v46 = vpop.f32.mrb[22].mxu1 }
 0x64a   :  { %v2016_v47 = vadd.f32 %v2012_v46, %v1945_v44  ;;  %v3155_v48 = vpop.f32.mrb[23].mxu0  ;;  %v3166_v49 = vpop.f32.mrb[23].mxu1  ;;  %v1942_v52 = vadd.f32 %v1938_v45, %v1871_v50 }
 0x64c   :  { %v2728_v51 = vmul.f32 -1.442695, %v2016_v47 }
 0x64e   :  { %3542 = vpow2.f32 %v2728_v51 }
 0x64f   :  { %3544 = vtanh.f32 %v1942_v52 }
 0x650   :  { %v3539_v53 = vpop.eup %3538 }
 0x651   :  { %v3541_v54 = vpop.eup %3540  ;;  %v1788_v55 = vadd.f32 1.0, %v3539_v53 }
 0x652   :  { %v1867_v56 = vadd.f32 1.0, %v3541_v54  ;;  %v2513_v54 = vld [vmem:[#allocation7 + $0x38] sm:$0xff] }
 0x653   :  { %3546 = vrcp.f32 %v1788_v55 }
 0x654   :  { %3548 = vrcp.f32 %v1867_v56 }
 0x658   :  { %v3543_v57 = vpop.eup %3542 }
 0x659   :  { %v3545_v58 = vpop.eup %3544  ;;  %v2020_v62 = vadd.f32 1.0, %v3543_v57 }
 0x65b   :  { %3550 = vrcp.f32 %v2020_v62 }
 0x65d   :  { %v3547_v59 = vpop.eup %3546 }
 0x65e   :  { %v3549_v60 = vpop.eup %3548  ;;  %v2024_v61 = vmul.f32 %v3547_v59, %v3545_v58 }
 0x65f   :  { %v2023_v63 = vmul.f32 %v3549_v60, %v4046_v30 }
 0x661   :  { %v4079_v2 = vadd.f32 %v2024_v61, %v2023_v63 }
 0x663   :  { %3552 = vtanh.f32 %v4079_v2 }
 0x665   :  { %v3551_v3 = vpop.eup %3550 }
 0x66d   :  { %v3553_v4 = vpop.eup %3552 }
 0x66e   :  { %v2027_v6 = vmul.f32 %v3553_v4, %v3551_v3 }
 0x670   :  { %3176 = vmatmul.mubr.msk.f32.vlgmr.msra.gmra.mrb[24].mxu0 %vm109_vm1, %v2027_v6  ;;  %2029 = vst.msk [vmem:[#allocation11 + $0x28] sm:$0xff] %vm109_vm1, %v2027_v6  ;;  %3187 = vmatmul.mubr.msk.f32.vlgmr.msra.gmra.mrb[24].mxu1 %vm109_vm1, %v2027_v6 }
 0x671   :  { %3413 = vmatpush3.bf16.msra.mxu0 %v3875_v18  ;;  %3419 = vmatpush3.bf16.msra.mxu1 %v3879_v19 }
 0x672   :  { %3414 = vmatprep.subr.bf16.mxu0 %v3733_v0  ;;  %3420 = vmatprep.subr.bf16.mxu1 %v3733_v0 }
 0x673   :  { %3197 = vmatprep.mubr.msk.f32.mxu0 %vm3734_vm0, %v3735_v1  ;;  %3208 = vmatprep.mubr.msk.f32.mxu1 %vm3734_vm0, %v3735_v1 }
 0x675   :  { %3416 = vmatpush3.bf16.msra.mxu0 %v3885_v24  ;;  %3422 = vmatpush3.bf16.msra.mxu1 %v3889_v25 }
 0x676   :  { %3423 = vmatprep.subr.bf16.mxu0 %v3733_v0  ;;  %3429 = vmatprep.subr.bf16.mxu1 %v3733_v0 }
 0x678   :  { %3198 = vmatmul.mubr.msk.f32.vlgmr.msra.gmra.mrb[26].mxu0 %vm109_vm1, %v2027_v6  ;;  %3209 = vmatmul.mubr.msk.f32.vlgmr.msra.gmra.mrb[26].mxu1 %vm109_vm1, %v2027_v6 }
 0x679   :  { %3425 = vmatpush3.bf16.msra.mxu0 %v3862_v5  ;;  %3431 = vmatpush3.bf16.msra.mxu1 %v3864_v9  ;;  %v2031_v5 = vld [vmem:[#allocation2 + $0x30] sm:$0xff] }
 0x67a   :  { %3426 = vmatprep.subr.bf16.mxu0 %v3733_v0  ;;  %3432 = vmatprep.subr.bf16.mxu1 %v3733_v0  ;;  %v2113_v9 = vld [vmem:[#allocation5 + $0x30] sm:$0xff] }
 0x67b   :  { %3219 = vmatprep.mubr.msk.f32.mxu0 %vm3734_vm0, %v3735_v1  ;;  %3230 = vmatprep.mubr.msk.f32.mxu1 %vm3734_vm0, %v3735_v1 }
 0x67d   :  { %3428 = vmatpush3.bf16.msra.mxu0 %v3867_v12  ;;  %3434 = vmatpush3.bf16.msra.mxu1 %v3871_v13 }
 0x67e   :  { %3435 = vmatprep.subr.bf16.mxu0 %v3733_v0  ;;  %3441 = vmatprep.subr.bf16.mxu1 %v3733_v0 }
 0x743   :  { %v2101_v7 = vpop.f32.mrb[24].mxu0  ;;  %v2180_v8 = vpop.f32.mrb[24].mxu1 }
 0x744   :  { %v2105_v10 = vadd.f32 %v2101_v7, %v2031_v5  ;;  %v2184_v11 = vadd.f32 %v2180_v8, %v2113_v9  ;;  %v3177_v14 = vpop.f32.mrb[25].mxu0  ;;  %v3188_v15 = vpop.f32.mrb[25].mxu1 }
 0x746   :  { %v2730_v16 = vmul.f32 -1.442695, %v2105_v10  ;;  %v2732_v17 = vmul.f32 -1.442695, %v2184_v11 }
 0x748   :  { %3554 = vpow2.f32 %v2730_v16 }
 0x749   :  { %3556 = vpow2.f32 %v2732_v17 }
 0x74b   :  { %v2259_v12 = vpop.f32.mrb[26].mxu0  ;;  %v2333_v21 = vpop.f32.mrb[26].mxu1 }
 0x74c   :  { %v2337_v13 = vadd.f32 %v2333_v21, %v2266_v20  ;;  %v3199_v22 = vpop.f32.mrb[27].mxu0  ;;  %v3210_v23 = vpop.f32.mrb[27].mxu1  ;;  %v2263_v28 = vadd.f32 %v2259_v12, %v2192_v26 }
 0x74e   :  { %v2735_v27 = vmul.f32 -1.442695, %v2337_v13 }
 0x750   :  { %3558 = vpow2.f32 %v2735_v27 }
 0x751   :  { %3560 = vtanh.f32 %v2263_v28 }
 0x752   :  { %v3555_v29 = vpop.eup %3554 }
 0x753   :  { %v3557_v30 = vpop.eup %3556  ;;  %v2109_v31 = vadd.f32 1.0, %v3555_v29 }
 0x754   :  { %v2188_v32 = vadd.f32 1.0, %v3557_v30 }
 0x755   :  { %3562 = vrcp.f32 %v2109_v31 }
 0x756   :  { %3564 = vrcp.f32 %v2188_v32 }
 0x75a   :  { %v3559_v33 = vpop.eup %3558 }
 0x75b   :  { %v3561_v34 = vpop.eup %3560  ;;  %v2341_v38 = vadd.f32 1.0, %v3559_v33 }
 0x75d   :  { %3566 = vrcp.f32 %v2341_v38 }
 0x75f   :  { %v3563_v35 = vpop.eup %3562 }
 0x760   :  { %v3565_v36 = vpop.eup %3564  ;;  %v2345_v37 = vmul.f32 %v3563_v35, %v3561_v34 }
 0x761   :  { %v2344_v39 = vmul.f32 %v3565_v36, %v4079_v2 }
 0x763   :  { %v2346_v40 = vadd.f32 %v2345_v37, %v2344_v39 }
 0x765   :  { %3568 = vtanh.f32 %v2346_v40 }
 0x767   :  { %v3567_v41 = vpop.eup %3566 }
 0x76f   :  { %v3569_v42 = vpop.eup %3568 }
 0x770   :  { %v2348_v43 = vmul.f32 %v3569_v42, %v3567_v41 }
 0x772   :  { %3220 = vmatmul.mubr.msk.f32.vlgmr.msra.gmra.mrb[28].mxu0 %vm109_vm1, %v2348_v43  ;;  %2350 = vst.msk [vmem:[#allocation11 + $0x30] sm:$0xff] %vm109_vm1, %v2348_v43  ;;  %3231 = vmatmul.mubr.msk.f32.vlgmr.msra.gmra.mrb[28].mxu1 %vm109_vm1, %v2348_v43 }
 0x773   :  { %3437 = vmatpush3.bf16.msra.mxu0 %v3875_v18  ;;  %3443 = vmatpush3.bf16.msra.mxu1 %v3879_v19  ;;  %v2352_v18 = vld [vmem:[#allocation2 + $0x38] sm:$0xff] }
 0x774   :  { %3438 = vmatprep.subr.bf16.mxu0 %v3733_v0  ;;  %3444 = vmatprep.subr.bf16.mxu1 %v3733_v0  ;;  %v2434_v19 = vld [vmem:[#allocation5 + $0x38] sm:$0xff] }
 0x775   :  { %3241 = vmatprep.mubr.msk.f32.mxu0 %vm3734_vm0, %v3735_v1  ;;  %3252 = vmatprep.mubr.msk.f32.mxu1 %vm3734_vm0, %v3735_v1  ;;  %v2587_v1 = vld [vmem:[#allocation8 + $0x38] sm:$0xff] }
 0x777   :  { %3440 = vmatpush3.bf16.msra.mxu0 %v3885_v24  ;;  %3446 = vmatpush3.bf16.msra.mxu1 %v3889_v25 }
 0x77a   :  { %3242 = vmatmul.mubr.msk.f32.vlgmr.msra.gmra.mrb[30].mxu0 %vm109_vm1, %v2348_v43  ;;  %3253 = vmatmul.mubr.msk.f32.vlgmr.msra.gmra.mrb[30].mxu1 %vm109_vm1, %v2348_v43 }
 0x845   :  { %v2422_v44 = vpop.f32.mrb[28].mxu0  ;;  %v2501_v45 = vpop.f32.mrb[28].mxu1 }
 0x846   :  { %v2426_v46 = vadd.f32 %v2422_v44, %v2352_v18  ;;  %v2505_v0 = vadd.f32 %v2501_v45, %v2434_v19  ;;  %v3221_v47 = vpop.f32.mrb[29].mxu0  ;;  %v3232_v48 = vpop.f32.mrb[29].mxu1 }
 0x848   :  { %v2737_v49 = vmul.f32 -1.442695, %v2426_v46  ;;  %v2739_v50 = vmul.f32 -1.442695, %v2505_v0 }
 0x84a   :  { %3570 = vpow2.f32 %v2737_v49 }
 0x84b   :  { %3572 = vpow2.f32 %v2739_v50 }
 0x84d   :  { %v2580_v24 = vpop.f32.mrb[30].mxu0  ;;  %v2654_v51 = vpop.f32.mrb[30].mxu1 }
 0x84e   :  { %v2658_v25 = vadd.f32 %v2654_v51, %v2587_v1  ;;  %v3243_v52 = vpop.f32.mrb[31].mxu0  ;;  %v3254_v53 = vpop.f32.mrb[31].mxu1  ;;  %v2584_v56 = vadd.f32 %v2580_v24, %v2513_v54 }
 0x850   :  { %v2742_v55 = vmul.f32 -1.442695, %v2658_v25 }
 0x852   :  { %3574 = vpow2.f32 %v2742_v55 }
 0x853   :  { %3576 = vtanh.f32 %v2584_v56 }
 0x854   :  { %v3571_v57 = vpop.eup %3570 }
 0x855   :  { %v3573_v58 = vpop.eup %3572  ;;  %v2430_v59 = vadd.f32 1.0, %v3571_v57 }
 0x856   :  { %v2509_v60 = vadd.f32 1.0, %v3573_v58 }
 0x857   :  { %3578 = vrcp.f32 %v2430_v59 }
 0x858   :  { %3580 = vrcp.f32 %v2509_v60 }
 0x85c   :  { %v3575_v61 = vpop.eup %3574 }
 0x85d   :  { %v3577_v62 = vpop.eup %3576  ;;  %v2662_v4 = vadd.f32 1.0, %v3575_v61 }
 0x85f   :  { %3582 = vrcp.f32 %v2662_v4 }
 0x861   :  { %v3579_v63 = vpop.eup %3578 }
 0x862   :  { %v3581_v2 = vpop.eup %3580  ;;  %v2666_v3 = vmul.f32 %v3579_v63, %v3577_v62 }
 0x863   :  { %v2665_v6 = vmul.f32 %v3581_v2, %v2346_v40 }
 0x865   :  { %v2667_v5 = vadd.f32 %v2666_v3, %v2665_v6 }
 0x867   :  { %3584 = vtanh.f32 %v2667_v5 }
 0x869   :  { %v3583_v9 = vpop.eup %3582 }
 0x871   :  { %v3585_v7 = vpop.eup %3584 }
 0x872   :  { %v2669_v8 = vmul.f32 %v3585_v7, %v3583_v9 }
 0x874   :  { %2671 = vst.msk [vmem:[#allocation11 + $0x38] sm:$0xff] %vm109_vm1, %v2669_v8 }
 0x875   :  { %3707 = shalt.err (!%p3704_p2)
}
 0x876   :  { %s3708_s7 = scalar_lea.hbm %s4148_s5, 1024 }
 0x877   :  { %p3709_p3 = scmp.ne.s32.totalorder %s4148_s5, %s3708_s7  ;;  %p3712_p4 = scmp.lt.u32.totalorder %s3708_s7, %s4148_s5 }
 0x879   :  { %p3714_p5 = pnand %p3712_p4, %p3709_p3 }
 0x87b   :  { %3717 = shalt.err (!%p3714_p5)
}
 0x87c   :  { %2683 = dma.vmem_to_hbm [thread:$0]  %s2678_s28, 1024, %s4148_s5, [#allocation4], %s3728_s30, %s3728_s30, %s3729_s6  }
 0x87d   :  { %3724 = dma.done.wait [#allocation4], 1024  }
 0x87e   :  { %3725 = vsyncadd [#allocation4], 4294966272 }
 0x87f   :  { %2687 = vsyncpa [#allocation3], 1 }
 0x880   :  { %2688 = vsyncpa [#allocation6], 1 }
 0x881   :  { %2689 = vsyncpa [#allocation9], 1 }
 0x882   :  { %2690 = vsyncpa [#allocation4], 1 }

</bundles_post_ra>
